<compile_context>
chip_gen: v7x
topology: tpu7x:2x2x1
jax: 0.10.0
libtpu: 0.0.40
codegen_flags: <defaults>
</compile_context>

<pallas_src>
import functools

import jax
import jax.numpy as jnp
from jax.experimental import pallas as pl
from jax.experimental.pallas import tpu as pltpu

EPS = 1e-12          # matches d3net.py's module-level EPS (passed into BN as eps=EPS)
LANES = 128
VMEM_LIMIT = 32 * 1024 * 1024     # explicit scoped-VMEM limit (safe on v5e/v6e/v7x)
VMEM_BUDGET = 20 * 1024 * 1024    # tile-sizing budget (double-buffered blocks + weights)


def _round_up(x, m):
    return (x + m - 1) // m * m


def _pick_row_tile(m, bytes_per_row, *, max_tile=512, budget=VMEM_BUDGET):
    """Row tile for the M = B*H*W axis: multiple of 8, double-buffered tiles fit budget."""
    tm = _round_up(min(max_tile, max(m, 8)), 8)
    while tm > 8 and 2 * tm * bytes_per_row > budget:
        tm = max(8, _round_up(tm // 2, 8))
    return tm


# ----------------------------- Pallas kernels ------------------------------ #

def _avgpool_kernel(x_ref, o_ref, *, inv_k):
    # x: (Kwin, tm, C) window taps for tm output pixels ; o: (tm, C)
    acc = jnp.sum(x_ref[...].astype(jnp.float32), axis=0)
    o_ref[...] = (acc * inv_k).astype(o_ref.dtype)


def _matmul_stats_kernel(p_ref, w_ref, y_ref, sum_ref, ssq_ref):
    # p: (tm, K=T*Cin) im2col patches, w: (K, Cpad), y: (tm, Cpad) pre-activation,
    # sum/ssq: (1, Cpad) per-tile channel statistics (for the BatchNorm reduction).
    # TODO(synk): cast matmul inputs to bf16 (f32 accumulation) for realistic channel
    #             counts; kept f32 here for bit-level parity at tiny test sizes.
    y = jnp.dot(p_ref[...], w_ref[...], preferred_element_type=jnp.float32)
    y_ref[...] = y.astype(y_ref.dtype)
    sum_ref[...] = jnp.sum(y, axis=0, keepdims=True)
    ssq_ref[...] = jnp.sum(y * y, axis=0, keepdims=True)


def _affine_relu_kernel(y_ref, scale_ref, shift_ref, o_ref):
    # y: (tm, Cpad), scale/shift: (1, Cpad) folded BN (or bias) affine ; o: (tm, Cpad)
    y = y_ref[...].astype(jnp.float32)
    out = jnp.maximum(y * scale_ref[...] + shift_ref[...], 0.0)
    o_ref[...] = out.astype(o_ref.dtype)


# ------------------------------ layer wrappers ------------------------------ #

def downsample_avgpool(x_nchw, down_scale, *, row_tile=1024):
    """F.pad(zero) + AvgPool2d(kernel=stride=down_scale, count_include_pad=True)."""
    B, C, H, W = x_nchw.shape
    Kh, Kw = down_scale
    Ph = (Kh - H % Kh) % Kh
    Pw = (Kw - W % Kw) % Kw
    x = jnp.pad(x_nchw, ((0, 0), (0, 0),
                         (Ph // 2, Ph - Ph // 2), (Pw // 2, Pw - Pw // 2)))
    Hp, Wp = H + Ph, W + Pw
    Hd, Wd = Hp // Kh, Wp // Kw
    Kwin = Kh * Kw
    M = B * Hd * Wd

    x = jnp.transpose(x, (0, 2, 3, 1))                       # NCHW -> NHWC
    x = x.reshape(B, Hd, Kh, Wd, Kw, C)
    x = jnp.transpose(x, (2, 4, 0, 1, 3, 5)).reshape(Kwin, M, C)

    tm = _pick_row_tile(M, (Kwin + 1) * C * 4, max_tile=row_tile)
    Mpad = _round_up(M, tm)
    x = jnp.pad(x, ((0, 0), (0, Mpad - M), (0, 0)))
    ntiles = Mpad // tm

    pooled = pl.pallas_call(
        functools.partial(_avgpool_kernel, inv_k=1.0 / Kwin),
        out_shape=jax.ShapeDtypeStruct((Mpad, C), x_nchw.dtype),
        grid=(ntiles,),
        in_specs=[pl.BlockSpec((Kwin, tm, C), lambda i: (0, i, 0))],
        out_specs=pl.BlockSpec((tm, C), lambda i: (i, 0)),
        compiler_params=pltpu.CompilerParams(
            dimension_semantics=("parallel",),
            vmem_limit_bytes=VMEM_LIMIT),
    )(x)
    return pooled[:M].reshape(B, Hd, Wd, C)


def dense_conv_bn_relu(x_nhwc, w, bias, gamma, beta, dilation, kernel_size,
                       *, eps=EPS, use_norm=True, row_tile=512):
    """Dilated 'same' conv + BatchNorm2d (training-mode batch stats) + ReLU."""
    B, H, W, Cin = x_nhwc.shape
    kh, kw = kernel_size
    T = kh * kw
    Cout = w.shape[-1]
    K = T * Cin
    M = B * H * W

    # --- im2col (JAX glue): taps concatenated along channels -> (M, T*Cin) so the
    #     whole conv is a single K=T*Cin contraction on the MXU.
    # TODO(synk): read tap windows in-kernel from the padded NHWC feature map (tap grid
    #             axis / pl.ds) to avoid materializing this T-times-expanded tensor in HBM.
    ph = dilation * (kh - 1) // 2
    pw = dilation * (kw - 1) // 2
    xp = jnp.pad(x_nhwc, ((0, 0), (ph, ph), (pw, pw), (0, 0)))
    taps = [xp[:, i * dilation:i * dilation + H, j * dilation:j * dilation + W, :]
            for i in range(kh) for j in range(kw)]
    patches = jnp.concatenate(taps, axis=-1).reshape(M, K)

    # --- lane-dense output channels (pad Cout to a multiple of 128 lanes).
    Cpad = _round_up(Cout, LANES)
    w_pad = jnp.pad(w.reshape(K, Cout).astype(jnp.float32), ((0, 0), (0, Cpad - Cout)))

    # --- row tiling (budget VMEM explicitly; weights stay resident).
    fixed = K * Cpad * 4
    budget = max(VMEM_BUDGET - fixed, 2 * 1024 * 1024)
    tm = _pick_row_tile(M, (K + 2 * Cpad) * 4, max_tile=row_tile, budget=budget)
    Mpad = _round_up(M, tm)
    patches = jnp.pad(patches, ((0, Mpad - M), (0, 0)))   # zero rows -> y rows are 0
    ntiles = Mpad // tm

    # --- pass 1: matmul + per-tile channel sum / sum-of-squares.
    y, psum, pssq = pl.pallas_call(
        _matmul_stats_kernel,
        out_shape=(
            jax.ShapeDtypeStruct((Mpad, Cpad), jnp.float32),
            jax.ShapeDtypeStruct((ntiles, Cpad), jnp.float32),
            jax.ShapeDtypeStruct((ntiles, Cpad), jnp.float32),
        ),
        grid=(ntiles,),
        in_specs=[
            pl.BlockSpec((tm, K), lambda i: (i, 0)),
            pl.BlockSpec((K, Cpad), lambda i: (0, 0)),
        ],
        out_specs=(
            pl.BlockSpec((tm, Cpad), lambda i: (i, 0)),
            pl.BlockSpec((1, Cpad), lambda i: (i, 0)),
            pl.BlockSpec((1, Cpad), lambda i: (i, 0)),
        ),
        compiler_params=pltpu.CompilerParams(
            dimension_semantics=("parallel",),
            vmem_limit_bytes=VMEM_LIMIT),
    )(patches, w_pad)

    # --- tiny per-channel reduction + fold BN into a single affine (scale, shift).
    bias_pad = jnp.pad(bias.astype(jnp.float32), (0, Cpad - Cout))
    if use_norm:
        count = jnp.float32(M)                       # padded rows are exact zeros
        mean = jnp.sum(psum, axis=0) / count
        var = jnp.maximum(jnp.sum(pssq, axis=0) / count - mean * mean, 0.0)
        gamma_pad = jnp.pad(gamma.astype(jnp.float32), (0, Cpad - Cout))
        beta_pad = jnp.pad(beta.astype(jnp.float32), (0, Cpad - Cout))
        scale = gamma_pad * jax.lax.rsqrt(var + eps)
        # Conv bias is cancelled exactly by training-mode mean subtraction, so it is
        # intentionally omitted from the matmul and from (scale, shift).
        shift = beta_pad - mean * scale
    else:
        scale = jnp.ones((Cpad,), jnp.float32)
        shift = bias_pad
    scale = scale.reshape(1, Cpad)
    shift = shift.reshape(1, Cpad)

    # --- pass 2: normalize / bias + ReLU (lane-dense, tiled, parallel).
    out = pl.pallas_call(
        _affine_relu_kernel,
        out_shape=jax.ShapeDtypeStruct((Mpad, Cpad), jnp.float32),
        grid=(ntiles,),
        in_specs=[
            pl.BlockSpec((tm, Cpad), lambda i: (i, 0)),
            pl.BlockSpec((1, Cpad), lambda i: (0, 0)),
            pl.BlockSpec((1, Cpad), lambda i: (0, 0)),
        ],
        out_specs=pl.BlockSpec((tm, Cpad), lambda i: (i, 0)),
        compiler_params=pltpu.CompilerParams(
            dimension_semantics=("parallel",),
            vmem_limit_bytes=VMEM_LIMIT),
    )(y, scale, shift)

    return out[:M, :Cout].reshape(B, H, W, Cout)


# ------------------------------ block structure ----------------------------- #

def d2_block(x_nhwc, layer_params, kernel_size, eps):
    """Dense D2 block; returns concat of all layer outputs (growth*depth channels)."""
    feats = x_nhwc
    outs = []
    for lp in layer_params:
        y = dense_conv_bn_relu(feats, lp["w"], lp["b"], lp["gamma"], lp["beta"],
                               lp["dilation"], kernel_size, eps=eps)
        outs.append(y)
        feats = jnp.concatenate([feats, y], axis=-1)      # dense connection
    return jnp.concatenate(outs, axis=-1)


def d3_block(x_nhwc, blocks_params, kernel_size, eps):
    stacked = [x_nhwc]
    x = x_nhwc
    for idx, bp in enumerate(blocks_params):
        if idx != 0:
            x = jnp.concatenate(stacked, axis=-1)
        x = d2_block(x, bp, kernel_size, eps)
        stacked.append(x)
    return jnp.concatenate(stacked[1:], axis=-1)


def down_d3_block(x_nchw, blocks_params, kernel_size, down_scale, eps=EPS):
    x = downsample_avgpool(x_nchw, down_scale)            # (B, Hd, Wd, Cin)
    y = d3_block(x, blocks_params, kernel_size, eps)      # (B, Hd, Wd, Cout)
    return jnp.transpose(y, (0, 3, 1, 2))                 # back to NCHW


# --------------------------- parameter init -------------------------------- #

def init_params(key, in_channels, growth_rate, kernel_size, num_blocks, depth):
    kh, kw = kernel_size
    T = kh * kw
    blocks = []
    cin_block = in_channels
    for _b in range(num_blocks):
        layers = []
        cin = cin_block
        for l_idx in range(depth):
            key, k1, k2 = jax.random.split(key, 3)
            scale = 1.0 / jnp.sqrt(jnp.float32(cin * T))
            layers.append(dict(
                w=jax.random.normal(k1, (T, cin, growth_rate), jnp.float32) * scale,
                b=jax.random.normal(k2, (growth_rate,), jnp.float32) * 0.01,
                gamma=jnp.ones((growth_rate,), jnp.float32),
                beta=jnp.zeros((growth_rate,), jnp.float32),
                dilation=2 ** l_idx,
            ))
            cin += growth_rate
        blocks.append(layers)
        cin_block += growth_rate * depth
    return blocks


# ------------------------------- main --------------------------------------- #

if __name__ == "__main__":
    key = jax.random.PRNGKey(0)
    B, Cin, H, W = 2, 4, 16, 16
    growth_rate, depth, num_blocks = 2, 2, 2
    kernel_size = (3, 3)
    down_scale = (2, 2)

    kx, kp = jax.random.split(key)
    x = jax.random.normal(kx, (B, Cin, H, W), jnp.float32)
    params = init_params(kp, Cin, growth_rate, kernel_size, num_blocks, depth)

    fwd = jax.jit(lambda inp: down_d3_block(inp, params, kernel_size, down_scale))
    out = jax.block_until_ready(fwd(x))

    expected_channels = num_blocks * growth_rate * depth
    assert out.shape == (B, expected_channels, H // down_scale[0], W // down_scale[1]), out.shape
    assert bool(jnp.all(jnp.isfinite(out)))
    print("KERNEL_OK")
</pallas_src>

<mosaic_0001>
module attributes {stable_mosaic.version = 11 : i64} {
  func.func @_avgpool_kernel(%arg0: i32, %arg1: memref<4x128x4xf32, #tpu.memory_space<vmem>>, %arg2: memref<128x4xf32, #tpu.memory_space<vmem>>) attributes {dimension_semantics = [#tpu.dimension_semantics<parallel>], iteration_bounds = array<i64: 1>, scalar_prefetch = 0 : i64, scratch_operands = 0 : i64, tpu.core_type = #tpu.core_type<tc>, window_params = [{transform_indices = @transform_0, window_bounds = array<i64: 4, 128, 4>}, {transform_indices = @transform_1, window_bounds = array<i64: 128, 4>}]} {
    %c0 = arith.constant 0 : index
    %c0_0 = arith.constant 0 : index
    %c0_1 = arith.constant 0 : index
    %0 = vector.load %arg1[%c0, %c0_0, %c0_1] : memref<4x128x4xf32, #tpu.memory_space<vmem>>, vector<4x128x4xf32>
    %cst = arith.constant dense<0.000000e+00> : vector<128x4xf32>
    %1 = vector.multi_reduction <add>, %0, %cst [0] : vector<4x128x4xf32> to vector<128x4xf32>
    %cst_2 = arith.constant 2.500000e-01 : f32
    %2 = vector.broadcast %cst_2 : f32 to vector<128x4xf32>
    %3 = arith.mulf %1, %2 : vector<128x4xf32>
    %c0_3 = arith.constant 0 : index
    %c0_4 = arith.constant 0 : index
    %4 = vector.load %arg2[%c0_3, %c0_4] : memref<128x4xf32, #tpu.memory_space<vmem>>, vector<128x4xf32>
    tpu.vector_store %arg2[%c0_3, %c0_4], %3 {strides = array<i32>} : memref<128x4xf32, #tpu.memory_space<vmem>>, vector<128x4xf32>,
    return
  }
  func.func @transform_0(%arg0: i32) -> (i32, i32, i32) {
    %c0_i32 = arith.constant 0 : i32
    %c0_i32_0 = arith.constant 0 : i32
    %c0_i32_1 = arith.constant 0 : i32
    return %c0_i32, %arg0, %c0_i32_0 : i32, i32, i32
  }
  func.func @transform_1(%arg0: i32) -> (i32, i32) {
    %c0_i32 = arith.constant 0 : i32
    %c0_i32_0 = arith.constant 0 : i32
    return %arg0, %c0_i32 : i32, i32
  }
}

module attributes {stable_mosaic.version = 11 : i64} {
  func.func @_matmul_stats_kernel(%arg0: i32, %arg1: memref<128x36xf32, #tpu.memory_space<vmem>>, %arg2: memref<36x128xf32, #tpu.memory_space<vmem>>, %arg3: memref<128x128xf32, #tpu.memory_space<vmem>>, %arg4: memref<1x128xf32, #tpu.memory_space<vmem>>, %arg5: memref<1x128xf32, #tpu.memory_space<vmem>>) attributes {dimension_semantics = [#tpu.dimension_semantics<parallel>], iteration_bounds = array<i64: 1>, scalar_prefetch = 0 : i64, scratch_operands = 0 : i64, tpu.core_type = #tpu.core_type<tc>, window_params = [{transform_indices = @transform_0, window_bounds = array<i64: 128, 36>}, {pipeline_mode = #tpu.pipeline_mode<synchronous>, transform_indices = @transform_1, window_bounds = array<i64: 36, 128>}, {transform_indices = @transform_2, window_bounds = array<i64: 128, 128>}, {transform_indices = @transform_3, window_bounds = array<i64: 1, 128>}, {transform_indices = @transform_4, window_bounds = array<i64: 1, 128>}]} {
    %c0 = arith.constant 0 : index
    %c0_0 = arith.constant 0 : index
    %0 = vector.load %arg1[%c0, %c0_0] : memref<128x36xf32, #tpu.memory_space<vmem>>, vector<128x36xf32>
    %c0_1 = arith.constant 0 : index
    %c0_2 = arith.constant 0 : index
    %1 = vector.load %arg2[%c0_1, %c0_2] : memref<36x128xf32, #tpu.memory_space<vmem>>, vector<36x128xf32>
    %cst = arith.constant dense<0.000000e+00> : vector<128x128xf32>
    %2 = tpu.matmul %0, %1, %cst {dimension_numbers = #tpu.dot_dimension_numbers<[1], [0], [0], [1], [0, 0, 1, 1], [], []>} : vector<128x36xf32>, vector<36x128xf32>, vector<128x128xf32> -> vector<128x128xf32>
    %c0_3 = arith.constant 0 : index
    %c0_4 = arith.constant 0 : index
    %3 = vector.load %arg3[%c0_3, %c0_4] : memref<128x128xf32, #tpu.memory_space<vmem>>, vector<128x128xf32>
    tpu.vector_store %arg3[%c0_3, %c0_4], %2 {strides = array<i32>} : memref<128x128xf32, #tpu.memory_space<vmem>>, vector<128x128xf32>,
    %cst_5 = arith.constant dense<0.000000e+00> : vector<128xf32>
    %4 = vector.multi_reduction <add>, %2, %cst_5 [0] : vector<128x128xf32> to vector<128xf32>
    %5 = vector.shape_cast %4 : vector<128xf32> to vector<1x128xf32>
    %c0_6 = arith.constant 0 : index
    %c0_7 = arith.constant 0 : index
    %6 = vector.load %arg4[%c0_6, %c0_7] : memref<1x128xf32, #tpu.memory_space<vmem>>, vector<1x128xf32>
    tpu.vector_store %arg4[%c0_6, %c0_7], %5 {strides = array<i32>} : memref<1x128xf32, #tpu.memory_space<vmem>>, vector<1x128xf32>,
    %7 = arith.mulf %2, %2 : vector<128x128xf32>
    %cst_8 = arith.constant dense<0.000000e+00> : vector<128xf32>
    %8 = vector.multi_reduction <add>, %7, %cst_8 [0] : vector<128x128xf32> to vector<128xf32>
    %9 = vector.shape_cast %8 : vector<128xf32> to vector<1x128xf32>
    %c0_9 = arith.constant 0 : index
    %c0_10 = arith.constant 0 : index
    %10 = vector.load %arg5[%c0_9, %c0_10] : memref<1x128xf32, #tpu.memory_space<vmem>>, vector<1x128xf32>
    tpu.vector_store %arg5[%c0_9, %c0_10], %9 {strides = array<i32>} : memref<1x128xf32, #tpu.memory_space<vmem>>, vector<1x128xf32>,
    return
  }
  func.func @transform_0(%arg0: i32) -> (i32, i32) {
    %c0_i32 = arith.constant 0 : i32
    %c0_i32_0 = arith.constant 0 : i32
    return %arg0, %c0_i32 : i32, i32
  }
  func.func @transform_1(%arg0: i32) -> (i32, i32) {
    %c0_i32 = arith.constant 0 : i32
    %c0_i32_0 = arith.constant 0 : i32
    %c0_i32_1 = arith.constant 0 : i32
    return %c0_i32, %c0_i32_0 : i32, i32
  }
  func.func @transform_2(%arg0: i32) -> (i32, i32) {
    %c0_i32 = arith.constant 0 : i32
    %c0_i32_0 = arith.constant 0 : i32
    return %arg0, %c0_i32 : i32, i32
  }
  func.func @transform_3(%arg0: i32) -> (i32, i32) {
    %c0_i32 = arith.constant 0 : i32
    %c0_i32_0 = arith.constant 0 : i32
    return %arg0, %c0_i32 : i32, i32
  }
  func.func @transform_4(%arg0: i32) -> (i32, i32) {
    %c0_i32 = arith.constant 0 : i32
    %c0_i32_0 = arith.constant 0 : i32
    return %arg0, %c0_i32 : i32, i32
  }
}

module attributes {stable_mosaic.version = 11 : i64} {
  func.func @_affine_relu_kernel(%arg0: i32, %arg1: memref<128x128xf32, #tpu.memory_space<vmem>>, %arg2: memref<1x128xf32, #tpu.memory_space<vmem>>, %arg3: memref<1x128xf32, #tpu.memory_space<vmem>>, %arg4: memref<128x128xf32, #tpu.memory_space<vmem>>) attributes {dimension_semantics = [#tpu.dimension_semantics<parallel>], iteration_bounds = array<i64: 1>, scalar_prefetch = 0 : i64, scratch_operands = 0 : i64, tpu.core_type = #tpu.core_type<tc>, window_params = [{transform_indices = @transform_0, window_bounds = array<i64: 128, 128>}, {pipeline_mode = #tpu.pipeline_mode<synchronous>, transform_indices = @transform_1, window_bounds = array<i64: 1, 128>}, {pipeline_mode = #tpu.pipeline_mode<synchronous>, transform_indices = @transform_2, window_bounds = array<i64: 1, 128>}, {transform_indices = @transform_3, window_bounds = array<i64: 128, 128>}]} {
    %c0 = arith.constant 0 : index
    %c0_0 = arith.constant 0 : index
    %0 = vector.load %arg1[%c0, %c0_0] : memref<128x128xf32, #tpu.memory_space<vmem>>, vector<128x128xf32>
    %c0_1 = arith.constant 0 : index
    %c0_2 = arith.constant 0 : index
    %1 = vector.load %arg2[%c0_1, %c0_2] : memref<1x128xf32, #tpu.memory_space<vmem>>, vector<1x128xf32>
    %2 = vector.broadcast %1 : vector<1x128xf32> to vector<128x128xf32>
    %3 = arith.mulf %0, %2 : vector<128x128xf32>
    %c0_3 = arith.constant 0 : index
    %c0_4 = arith.constant 0 : index
    %4 = vector.load %arg3[%c0_3, %c0_4] : memref<1x128xf32, #tpu.memory_space<vmem>>, vector<1x128xf32>
    %5 = vector.broadcast %4 : vector<1x128xf32> to vector<128x128xf32>
    %6 = arith.addf %3, %5 : vector<128x128xf32>
    %cst = arith.constant 0.000000e+00 : f32
    %7 = vector.broadcast %cst : f32 to vector<128x128xf32>
    %8 = arith.maximumf %6, %7 : vector<128x128xf32>
    %c0_5 = arith.constant 0 : index
    %c0_6 = arith.constant 0 : index
    %9 = vector.load %arg4[%c0_5, %c0_6] : memref<128x128xf32, #tpu.memory_space<vmem>>, vector<128x128xf32>
    tpu.vector_store %arg4[%c0_5, %c0_6], %8 {strides = array<i32>} : memref<128x128xf32, #tpu.memory_space<vmem>>, vector<128x128xf32>,
    return
  }
  func.func @transform_0(%arg0: i32) -> (i32, i32) {
    %c0_i32 = arith.constant 0 : i32
    %c0_i32_0 = arith.constant 0 : i32
    return %arg0, %c0_i32 : i32, i32
  }
  func.func @transform_1(%arg0: i32) -> (i32, i32) {
    %c0_i32 = arith.constant 0 : i32
    %c0_i32_0 = arith.constant 0 : i32
    %c0_i32_1 = arith.constant 0 : i32
    return %c0_i32, %c0_i32_0 : i32, i32
  }
  func.func @transform_2(%arg0: i32) -> (i32, i32) {
    %c0_i32 = arith.constant 0 : i32
    %c0_i32_0 = arith.constant 0 : i32
    %c0_i32_1 = arith.constant 0 : i32
    return %c0_i32, %c0_i32_0 : i32, i32
  }
  func.func @transform_3(%arg0: i32) -> (i32, i32) {
    %c0_i32 = arith.constant 0 : i32
    %c0_i32_0 = arith.constant 0 : i32
    return %arg0, %c0_i32 : i32, i32
  }
}

module attributes {stable_mosaic.version = 11 : i64} {
  func.func @_matmul_stats_kernel(%arg0: i32, %arg1: memref<128x54xf32, #tpu.memory_space<vmem>>, %arg2: memref<54x128xf32, #tpu.memory_space<vmem>>, %arg3: memref<128x128xf32, #tpu.memory_space<vmem>>, %arg4: memref<1x128xf32, #tpu.memory_space<vmem>>, %arg5: memref<1x128xf32, #tpu.memory_space<vmem>>) attributes {dimension_semantics = [#tpu.dimension_semantics<parallel>], iteration_bounds = array<i64: 1>, scalar_prefetch = 0 : i64, scratch_operands = 0 : i64, tpu.core_type = #tpu.core_type<tc>, window_params = [{transform_indices = @transform_0, window_bounds = array<i64: 128, 54>}, {pipeline_mode = #tpu.pipeline_mode<synchronous>, transform_indices = @transform_1, window_bounds = array<i64: 54, 128>}, {transform_indices = @transform_2, window_bounds = array<i64: 128, 128>}, {transform_indices = @transform_3, window_bounds = array<i64: 1, 128>}, {transform_indices = @transform_4, window_bounds = array<i64: 1, 128>}]} {
    %c0 = arith.constant 0 : index
    %c0_0 = arith.constant 0 : index
    %0 = vector.load %arg1[%c0, %c0_0] : memref<128x54xf32, #tpu.memory_space<vmem>>, vector<128x54xf32>
    %c0_1 = arith.constant 0 : index
    %c0_2 = arith.constant 0 : index
    %1 = vector.load %arg2[%c0_1, %c0_2] : memref<54x128xf32, #tpu.memory_space<vmem>>, vector<54x128xf32>
    %cst = arith.constant dense<0.000000e+00> : vector<128x128xf32>
    %2 = tpu.matmul %0, %1, %cst {dimension_numbers = #tpu.dot_dimension_numbers<[1], [0], [0], [1], [0, 0, 1, 1], [], []>} : vector<128x54xf32>, vector<54x128xf32>, vector<128x128xf32> -> vector<128x128xf32>
    %c0_3 = arith.constant 0 : index
    %c0_4 = arith.constant 0 : index
    %3 = vector.load %arg3[%c0_3, %c0_4] : memref<128x128xf32, #tpu.memory_space<vmem>>, vector<128x128xf32>
    tpu.vector_store %arg3[%c0_3, %c0_4], %2 {strides = array<i32>} : memref<128x128xf32, #tpu.memory_space<vmem>>, vector<128x128xf32>,
    %cst_5 = arith.constant dense<0.000000e+00> : vector<128xf32>
    %4 = vector.multi_reduction <add>, %2, %cst_5 [0] : vector<128x128xf32> to vector<128xf32>
    %5 = vector.shape_cast %4 : vector<128xf32> to vector<1x128xf32>
    %c0_6 = arith.constant 0 : index
    %c0_7 = arith.constant 0 : index
    %6 = vector.load %arg4[%c0_6, %c0_7] : memref<1x128xf32, #tpu.memory_space<vmem>>, vector<1x128xf32>
    tpu.vector_store %arg4[%c0_6, %c0_7], %5 {strides = array<i32>} : memref<1x128xf32, #tpu.memory_space<vmem>>, vector<1x128xf32>,
    %7 = arith.mulf %2, %2 : vector<128x128xf32>
    %cst_8 = arith.constant dense<0.000000e+00> : vector<128xf32>
    %8 = vector.multi_reduction <add>, %7, %cst_8 [0] : vector<128x128xf32> to vector<128xf32>
    %9 = vector.shape_cast %8 : vector<128xf32> to vector<1x128xf32>
    %c0_9 = arith.constant 0 : index
    %c0_10 = arith.constant 0 : index
    %10 = vector.load %arg5[%c0_9, %c0_10] : memref<1x128xf32, #tpu.memory_space<vmem>>, vector<1x128xf32>
    tpu.vector_store %arg5[%c0_9, %c0_10], %9 {strides = array<i32>} : memref<1x128xf32, #tpu.memory_space<vmem>>, vector<1x128xf32>,
    return
  }
  func.func @transform_0(%arg0: i32) -> (i32, i32) {
    %c0_i32 = arith.constant 0 : i32
    %c0_i32_0 = arith.constant 0 : i32
    return %arg0, %c0_i32 : i32, i32
  }
  func.func @transform_1(%arg0: i32) -> (i32, i32) {
    %c0_i32 = arith.constant 0 : i32
    %c0_i32_0 = arith.constant 0 : i32
    %c0_i32_1 = arith.constant 0 : i32
    return %c0_i32, %c0_i32_0 : i32, i32
  }
  func.func @transform_2(%arg0: i32) -> (i32, i32) {
    %c0_i32 = arith.constant 0 : i32
    %c0_i32_0 = arith.constant 0 : i32
    return %arg0, %c0_i32 : i32, i32
  }
  func.func @transform_3(%arg0: i32) -> (i32, i32) {
    %c0_i32 = arith.constant 0 : i32
    %c0_i32_0 = arith.constant 0 : i32
    return %arg0, %c0_i32 : i32, i32
  }
  func.func @transform_4(%arg0: i32) -> (i32, i32) {
    %c0_i32 = arith.constant 0 : i32
    %c0_i32_0 = arith.constant 0 : i32
    return %arg0, %c0_i32 : i32, i32
  }
}

module attributes {stable_mosaic.version = 11 : i64} {
  func.func @_matmul_stats_kernel(%arg0: i32, %arg1: memref<128x72xf32, #tpu.memory_space<vmem>>, %arg2: memref<72x128xf32, #tpu.memory_space<vmem>>, %arg3: memref<128x128xf32, #tpu.memory_space<vmem>>, %arg4: memref<1x128xf32, #tpu.memory_space<vmem>>, %arg5: memref<1x128xf32, #tpu.memory_space<vmem>>) attributes {dimension_semantics = [#tpu.dimension_semantics<parallel>], iteration_bounds = array<i64: 1>, scalar_prefetch = 0 : i64, scratch_operands = 0 : i64, tpu.core_type = #tpu.core_type<tc>, window_params = [{transform_indices = @transform_0, window_bounds = array<i64: 128, 72>}, {pipeline_mode = #tpu.pipeline_mode<synchronous>, transform_indices = @transform_1, window_bounds = array<i64: 72, 128>}, {transform_indices = @transform_2, window_bounds = array<i64: 128, 128>}, {transform_indices = @transform_3, window_bounds = array<i64: 1, 128>}, {transform_indices = @transform_4, window_bounds = array<i64: 1, 128>}]} {
    %c0 = arith.constant 0 : index
    %c0_0 = arith.constant 0 : index
    %0 = vector.load %arg1[%c0, %c0_0] : memref<128x72xf32, #tpu.memory_space<vmem>>, vector<128x72xf32>
    %c0_1 = arith.constant 0 : index
    %c0_2 = arith.constant 0 : index
    %1 = vector.load %arg2[%c0_1, %c0_2] : memref<72x128xf32, #tpu.memory_space<vmem>>, vector<72x128xf32>
    %cst = arith.constant dense<0.000000e+00> : vector<128x128xf32>
    %2 = tpu.matmul %0, %1, %cst {dimension_numbers = #tpu.dot_dimension_numbers<[1], [0], [0], [1], [0, 0, 1, 1], [], []>} : vector<128x72xf32>, vector<72x128xf32>, vector<128x128xf32> -> vector<128x128xf32>
    %c0_3 = arith.constant 0 : index
    %c0_4 = arith.constant 0 : index
    %3 = vector.load %arg3[%c0_3, %c0_4] : memref<128x128xf32, #tpu.memory_space<vmem>>, vector<128x128xf32>
    tpu.vector_store %arg3[%c0_3, %c0_4], %2 {strides = array<i32>} : memref<128x128xf32, #tpu.memory_space<vmem>>, vector<128x128xf32>,
    %cst_5 = arith.constant dense<0.000000e+00> : vector<128xf32>
    %4 = vector.multi_reduction <add>, %2, %cst_5 [0] : vector<128x128xf32> to vector<128xf32>
    %5 = vector.shape_cast %4 : vector<128xf32> to vector<1x128xf32>
    %c0_6 = arith.constant 0 : index
    %c0_7 = arith.constant 0 : index
    %6 = vector.load %arg4[%c0_6, %c0_7] : memref<1x128xf32, #tpu.memory_space<vmem>>, vector<1x128xf32>
    tpu.vector_store %arg4[%c0_6, %c0_7], %5 {strides = array<i32>} : memref<1x128xf32, #tpu.memory_space<vmem>>, vector<1x128xf32>,
    %7 = arith.mulf %2, %2 : vector<128x128xf32>
    %cst_8 = arith.constant dense<0.000000e+00> : vector<128xf32>
    %8 = vector.multi_reduction <add>, %7, %cst_8 [0] : vector<128x128xf32> to vector<128xf32>
    %9 = vector.shape_cast %8 : vector<128xf32> to vector<1x128xf32>
    %c0_9 = arith.constant 0 : index
    %c0_10 = arith.constant 0 : index
    %10 = vector.load %arg5[%c0_9, %c0_10] : memref<1x128xf32, #tpu.memory_space<vmem>>, vector<1x128xf32>
    tpu.vector_store %arg5[%c0_9, %c0_10], %9 {strides = array<i32>} : memref<1x128xf32, #tpu.memory_space<vmem>>, vector<1x128xf32>,
    return
  }
  func.func @transform_0(%arg0: i32) -> (i32, i32) {
    %c0_i32 = arith.constant 0 : i32
    %c0_i32_0 = arith.constant 0 : i32
    return %arg0, %c0_i32 : i32, i32
  }
  func.func @transform_1(%arg0: i32) -> (i32, i32) {
    %c0_i32 = arith.constant 0 : i32
    %c0_i32_0 = arith.constant 0 : i32
    %c0_i32_1 = arith.constant 0 : i32
    return %c0_i32, %c0_i32_0 : i32, i32
  }
  func.func @transform_2(%arg0: i32) -> (i32, i32) {
    %c0_i32 = arith.constant 0 : i32
    %c0_i32_0 = arith.constant 0 : i32
    return %arg0, %c0_i32 : i32, i32
  }
  func.func @transform_3(%arg0: i32) -> (i32, i32) {
    %c0_i32 = arith.constant 0 : i32
    %c0_i32_0 = arith.constant 0 : i32
    return %arg0, %c0_i32 : i32, i32
  }
  func.func @transform_4(%arg0: i32) -> (i32, i32) {
    %c0_i32 = arith.constant 0 : i32
    %c0_i32_0 = arith.constant 0 : i32
    return %arg0, %c0_i32 : i32, i32
  }
}

module attributes {stable_mosaic.version = 11 : i64} {
  func.func @_matmul_stats_kernel(%arg0: i32, %arg1: memref<128x90xf32, #tpu.memory_space<vmem>>, %arg2: memref<90x128xf32, #tpu.memory_space<vmem>>, %arg3: memref<128x128xf32, #tpu.memory_space<vmem>>, %arg4: memref<1x128xf32, #tpu.memory_space<vmem>>, %arg5: memref<1x128xf32, #tpu.memory_space<vmem>>) attributes {dimension_semantics = [#tpu.dimension_semantics<parallel>], iteration_bounds = array<i64: 1>, scalar_prefetch = 0 : i64, scratch_operands = 0 : i64, tpu.core_type = #tpu.core_type<tc>, window_params = [{transform_indices = @transform_0, window_bounds = array<i64: 128, 90>}, {pipeline_mode = #tpu.pipeline_mode<synchronous>, transform_indices = @transform_1, window_bounds = array<i64: 90, 128>}, {transform_indices = @transform_2, window_bounds = array<i64: 128, 128>}, {transform_indices = @transform_3, window_bounds = array<i64: 1, 128>}, {transform_indices = @transform_4, window_bounds = array<i64: 1, 128>}]} {
    %c0 = arith.constant 0 : index
    %c0_0 = arith.constant 0 : index
    %0 = vector.load %arg1[%c0, %c0_0] : memref<128x90xf32, #tpu.memory_space<vmem>>, vector<128x90xf32>
    %c0_1 = arith.constant 0 : index
    %c0_2 = arith.constant 0 : index
    %1 = vector.load %arg2[%c0_1, %c0_2] : memref<90x128xf32, #tpu.memory_space<vmem>>, vector<90x128xf32>
    %cst = arith.constant dense<0.000000e+00> : vector<128x128xf32>
    %2 = tpu.matmul %0, %1, %cst {dimension_numbers = #tpu.dot_dimension_numbers<[1], [0], [0], [1], [0, 0, 1, 1], [], []>} : vector<128x90xf32>, vector<90x128xf32>, vector<128x128xf32> -> vector<128x128xf32>
    %c0_3 = arith.constant 0 : index
    %c0_4 = arith.constant 0 : index
    %3 = vector.load %arg3[%c0_3, %c0_4] : memref<128x128xf32, #tpu.memory_space<vmem>>, vector<128x128xf32>
    tpu.vector_store %arg3[%c0_3, %c0_4], %2 {strides = array<i32>} : memref<128x128xf32, #tpu.memory_space<vmem>>, vector<128x128xf32>,
    %cst_5 = arith.constant dense<0.000000e+00> : vector<128xf32>
    %4 = vector.multi_reduction <add>, %2, %cst_5 [0] : vector<128x128xf32> to vector<128xf32>
    %5 = vector.shape_cast %4 : vector<128xf32> to vector<1x128xf32>
    %c0_6 = arith.constant 0 : index
    %c0_7 = arith.constant 0 : index
    %6 = vector.load %arg4[%c0_6, %c0_7] : memref<1x128xf32, #tpu.memory_space<vmem>>, vector<1x128xf32>
    tpu.vector_store %arg4[%c0_6, %c0_7], %5 {strides = array<i32>} : memref<1x128xf32, #tpu.memory_space<vmem>>, vector<1x128xf32>,
    %7 = arith.mulf %2, %2 : vector<128x128xf32>
    %cst_8 = arith.constant dense<0.000000e+00> : vector<128xf32>
    %8 = vector.multi_reduction <add>, %7, %cst_8 [0] : vector<128x128xf32> to vector<128xf32>
    %9 = vector.shape_cast %8 : vector<128xf32> to vector<1x128xf32>
    %c0_9 = arith.constant 0 : index
    %c0_10 = arith.constant 0 : index
    %10 = vector.load %arg5[%c0_9, %c0_10] : memref<1x128xf32, #tpu.memory_space<vmem>>, vector<1x128xf32>
    tpu.vector_store %arg5[%c0_9, %c0_10], %9 {strides = array<i32>} : memref<1x128xf32, #tpu.memory_space<vmem>>, vector<1x128xf32>,
    return
  }
  func.func @transform_0(%arg0: i32) -> (i32, i32) {
    %c0_i32 = arith.constant 0 : i32
    %c0_i32_0 = arith.constant 0 : i32
    return %arg0, %c0_i32 : i32, i32
  }
  func.func @transform_1(%arg0: i32) -> (i32, i32) {
    %c0_i32 = arith.constant 0 : i32
    %c0_i32_0 = arith.constant 0 : i32
    %c0_i32_1 = arith.constant 0 : i32
    return %c0_i32, %c0_i32_0 : i32, i32
  }
  func.func @transform_2(%arg0: i32) -> (i32, i32) {
    %c0_i32 = arith.constant 0 : i32
    %c0_i32_0 = arith.constant 0 : i32
    return %arg0, %c0_i32 : i32, i32
  }
  func.func @transform_3(%arg0: i32) -> (i32, i32) {
    %c0_i32 = arith.constant 0 : i32
    %c0_i32_0 = arith.constant 0 : i32
    return %arg0, %c0_i32 : i32, i32
  }
  func.func @transform_4(%arg0: i32) -> (i32, i32) {
    %c0_i32 = arith.constant 0 : i32
    %c0_i32_0 = arith.constant 0 : i32
    return %arg0, %c0_i32 : i32, i32
  }
}

</mosaic_0001>

<bundles_post_ra>
// kernel: _lambda_.9
= control target key start
LH: loop header
LB: loop body
LE: loop exit
PB: predicated region body
PF: predicated region fallthrough
CT: control target
= control target key end

     0   :  { %vm72_vm0 = vcmask 31744   ;;  %s551_s0 = inlined_call_operand.vmem [shape: f32[4,128,4], index: 0, kind: input, shape index: {}]   ;;  %s552_s1 = inlined_call_operand.vmem [shape: f32[128,4], index: 1, kind: output, shape index: {}]  }
   0x1   :  { %v8_v0 = vld [vmem:[%s551_s0] sm:$0xff]  ;;  %v9_v7 = vld [vmem:[%s551_s0 + $0x8] sm:$0xff]  ;;  %v10_v15 = vld [vmem:[%s551_s0 + $0x10] sm:$0xff] }
   0x2   :  { %v24_v1 = vld [vmem:[%s551_s0 + $0x80] sm:$0xff]  ;;  %v73_v4 = vsel %vm72_vm0, %v8_v0, 0.0  ;;  %v25_v8 = vld [vmem:[%s551_s0 + $0x88] sm:$0xff]  ;;  %v80_v13 = vsel %vm72_vm0, %v9_v7, 0.0  ;;  %v26_v19 = vld [vmem:[%s551_s0 + $0x90] sm:$0xff]  ;;  %v87_v22 = vsel %vm72_vm0, %v10_v15, 0.0 }
   0x3   :  { %v40_v2 = vld [vmem:[%s551_s0 + $0x100] sm:$0xff]  ;;  %v74_v5 = vsel %vm72_vm0, %v24_v1, 0.0  ;;  %v41_v11 = vld [vmem:[%s551_s0 + $0x108] sm:$0xff]  ;;  %v81_v14 = vsel %vm72_vm0, %v25_v8, 0.0  ;;  %v42_v20 = vld [vmem:[%s551_s0 + $0x110] sm:$0xff]  ;;  %v88_v24 = vsel %vm72_vm0, %v26_v19, 0.0 }
   0x4   :  { %v56_v3 = vld [vmem:[%s551_s0 + $0x180] sm:$0xff]  ;;  %v76_v6 = vsel %vm72_vm0, %v40_v2, 0.0  ;;  %v75_v9 = vadd.f32 %v74_v5, %v73_v4  ;;  %v57_v12 = vld [vmem:[%s551_s0 + $0x188] sm:$0xff]  ;;  %v82_v16 = vadd.f32 %v81_v14, %v80_v13  ;;  %v83_v17 = vsel %vm72_vm0, %v41_v11, 0.0  ;;  %v58_v21 = vld [vmem:[%s551_s0 + $0x190] sm:$0xff] }
   0x5   :  { %v78_v10 = vsel %vm72_vm0, %v56_v3, 0.0  ;;  %v85_v18 = vsel %vm72_vm0, %v57_v12, 0.0  ;;  %v90_v25 = vsel %vm72_vm0, %v42_v20, 0.0  ;;  %v92_v26 = vsel %vm72_vm0, %v58_v21, 0.0  ;;  %v11_v27 = vld [vmem:[%s551_s0 + $0x18] sm:$0xff]  ;;  %v12_v35 = vld [vmem:[%s551_s0 + $0x20] sm:$0xff] }
   0x6   :  { %v77_v23 = vadd.f32 %v76_v6, %v75_v9  ;;  %v27_v28 = vld [vmem:[%s551_s0 + $0x98] sm:$0xff]  ;;  %v84_v30 = vadd.f32 %v83_v17, %v82_v16  ;;  %v89_v31 = vadd.f32 %v88_v24, %v87_v22  ;;  %v94_v33 = vsel %vm72_vm0, %v11_v27, 0.0  ;;  %v28_v36 = vld [vmem:[%s551_s0 + $0xa0] sm:$0xff]  ;;  %v13_v43 = vld [vmem:[%s551_s0 + $0x28] sm:$0xff] }
   0x7   :  { %v43_v29 = vld [vmem:[%s551_s0 + $0x118] sm:$0xff]  ;;  %v95_v34 = vsel %vm72_vm0, %v27_v28, 0.0  ;;  %v44_v41 = vld [vmem:[%s551_s0 + $0x120] sm:$0xff]  ;;  %v101_v46 = vsel %vm72_vm0, %v12_v35, 0.0  ;;  %v102_v47 = vsel %vm72_vm0, %v28_v36, 0.0  ;;  %v29_v48 = vld [vmem:[%s551_s0 + $0xa8] sm:$0xff] }
   0x8   :  { %v59_v32 = vld [vmem:[%s551_s0 + $0x198] sm:$0xff]  ;;  %v79_v37 = vadd.f32 %v78_v10, %v77_v23  ;;  %v96_v38 = vadd.f32 %v95_v34, %v94_v33  ;;  %v97_v39 = vsel %vm72_vm0, %v43_v29, 0.0  ;;  %v60_v42 = vld [vmem:[%s551_s0 + $0x1a0] sm:$0xff]  ;;  %v86_v44 = vadd.f32 %v85_v18, %v84_v30  ;;  %v45_v49 = vld [vmem:[%s551_s0 + $0x128] sm:$0xff] }
   0x9   :  { %v99_v40 = vsel %vm72_vm0, %v59_v32, 0.0  ;;  %v91_v45 = vadd.f32 %v90_v25, %v89_v31  ;;  %v103_v52 = vadd.f32 %v102_v47, %v101_v46  ;;  %v104_v53 = vsel %vm72_vm0, %v44_v41, 0.0  ;;  %v61_v54 = vld [vmem:[%s551_s0 + $0x1a8] sm:$0xff]  ;;  %v14_v55 = vld [vmem:[%s551_s0 + $0x30] sm:$0xff]  ;;  %v15_v2 = vld [vmem:[%s551_s0 + $0x38] sm:$0xff] }
   0xa   :  { %v185_v50 = vmul.f32 0.25, %v79_v37  ;;  %v98_v51 = vadd.f32 %v97_v39, %v96_v38  ;;  %v186_v56 = vmul.f32 0.25, %v86_v44  ;;  %v106_v58 = vsel %vm72_vm0, %v60_v42, 0.0  ;;  %v30_v60 = vld [vmem:[%s551_s0 + $0xb0] sm:$0xff]  ;;  %v31_v8 = vld [vmem:[%s551_s0 + $0xb8] sm:$0xff]  ;;  %v16_v15 = vld [vmem:[%s551_s0 + $0x40] sm:$0xff] }
   0xb   :  { %v93_v57 = vadd.f32 %v92_v26, %v91_v45  ;;  %v108_v59 = vsel %vm72_vm0, %v13_v43, 0.0  ;;  %v46_v61 = vld [vmem:[%s551_s0 + $0x130] sm:$0xff]  ;;  %v105_v63 = vadd.f32 %v104_v53, %v103_v52  ;;  %v109_v0 = vsel %vm72_vm0, %v29_v48, 0.0  ;;  %v47_v9 = vld [vmem:[%s551_s0 + $0x138] sm:$0xff]  ;;  %v32_v19 = vld [vmem:[%s551_s0 + $0xc0] sm:$0xff] }
   0xc   :  { %201 = vst.msk [vmem:[%s552_s1] sm:$0xff] %vm72_vm0, %v185_v50  ;;  %v100_v62 = vadd.f32 %v99_v40, %v98_v51  ;;  %v111_v1 = vsel %vm72_vm0, %v45_v49, 0.0  ;;  %202 = vst.msk [vmem:[%s552_s1 + $0x8] sm:$0xff] %vm72_vm0, %v186_v56  ;;  %v110_v4 = vadd.f32 %v109_v0, %v108_v59  ;;  %v113_v5 = vsel %vm72_vm0, %v61_v54, 0.0  ;;  %v62_v6 = vld [vmem:[%s551_s0 + $0x1b0] sm:$0xff]  ;;  %v63_v14 = vld [vmem:[%s551_s0 + $0x1b8] sm:$0xff] }
   0xd   :  { %v187_v3 = vmul.f32 0.25, %v93_v57  ;;  %v115_v7 = vsel %vm72_vm0, %v14_v55, 0.0  ;;  %v107_v11 = vadd.f32 %v106_v58, %v105_v63  ;;  %v116_v12 = vsel %vm72_vm0, %v30_v60, 0.0  ;;  %v48_v20 = vld [vmem:[%s551_s0 + $0x140] sm:$0xff]  ;;  %v17_v21 = vld [vmem:[%s551_s0 + $0x48] sm:$0xff]  ;;  %v18_v33 = vld [vmem:[%s551_s0 + $0x50] sm:$0xff] }
   0xe   :  { %v188_v10 = vmul.f32 0.25, %v100_v62  ;;  %v118_v13 = vsel %vm72_vm0, %v46_v61, 0.0  ;;  %v112_v16 = vadd.f32 %v111_v1, %v110_v4  ;;  %v117_v17 = vadd.f32 %v116_v12, %v115_v7  ;;  %v64_v26 = vld [vmem:[%s551_s0 + $0x1c0] sm:$0xff]  ;;  %v33_v31 = vld [vmem:[%s551_s0 + $0xc8] sm:$0xff]  ;;  %v34_v43 = vld [vmem:[%s551_s0 + $0xd0] sm:$0xff] }
   0xf   :  { %203 = vst.msk [vmem:[%s552_s1 + $0x10] sm:$0xff] %vm72_vm0, %v187_v3  ;;  %v122_v18 = vsel %vm72_vm0, %v15_v2, 0.0  ;;  %v189_v22 = vmul.f32 0.25, %v107_v11  ;;  %v120_v23 = vsel %vm72_vm0, %v62_v6, 0.0  ;;  %v123_v24 = vsel %vm72_vm0, %v31_v8, 0.0  ;;  %v49_v32 = vld [vmem:[%s551_s0 + $0x148] sm:$0xff] }
  0x10   :  { %204 = vst.msk [vmem:[%s552_s1 + $0x18] sm:$0xff] %vm72_vm0, %v188_v10  ;;  %v125_v25 = vsel %vm72_vm0, %v47_v9, 0.0  ;;  %v114_v27 = vadd.f32 %v113_v5, %v112_v16  ;;  %v119_v28 = vadd.f32 %v118_v13, %v117_v17  ;;  %v124_v29 = vadd.f32 %v123_v24, %v122_v18  ;;  %v65_v37 = vld [vmem:[%s551_s0 + $0x1c8] sm:$0xff]  ;;  %v50_v44 = vld [vmem:[%s551_s0 + $0x150] sm:$0xff]  ;;  %v19_v45 = vld [vmem:[%s551_s0 + $0x58] sm:$0xff] }
  0x11   :  { %v129_v30 = vsel %vm72_vm0, %v16_v15, 0.0  ;;  %205 = vst.msk [vmem:[%s552_s1 + $0x20] sm:$0xff] %vm72_vm0, %v189_v22  ;;  %v127_v34 = vsel %vm72_vm0, %v63_v14, 0.0  ;;  %v130_v35 = vsel %vm72_vm0, %v32_v19, 0.0  ;;  %v132_v36 = vsel %vm72_vm0, %v48_v20, 0.0  ;;  %v66_v49 = vld [vmem:[%s551_s0 + $0x1d0] sm:$0xff] }
  0x12   :  { %v136_v38 = vsel %vm72_vm0, %v17_v21, 0.0  ;;  %v190_v39 = vmul.f32 0.25, %v114_v27  ;;  %v121_v40 = vadd.f32 %v120_v23, %v119_v28  ;;  %v126_v41 = vadd.f32 %v125_v25, %v124_v29  ;;  %v35_v55 = vld [vmem:[%s551_s0 + $0xd8] sm:$0xff]  ;;  %v20_v57 = vld [vmem:[%s551_s0 + $0x60] sm:$0xff]  ;;  %v21_v5 = vld [vmem:[%s551_s0 + $0x68] sm:$0xff] }
  0x13   :  { %v131_v42 = vadd.f32 %v130_v35, %v129_v30  ;;  %v134_v46 = vsel %vm72_vm0, %v64_v26, 0.0  ;;  %v137_v47 = vsel %vm72_vm0, %v33_v31, 0.0  ;;  %v139_v48 = vsel %vm72_vm0, %v49_v32, 0.0  ;;  %v51_v56 = vld [vmem:[%s551_s0 + $0x158] sm:$0xff]  ;;  %v36_v3 = vld [vmem:[%s551_s0 + $0xe0] sm:$0xff]  ;;  %v37_v15 = vld [vmem:[%s551_s0 + $0xe8] sm:$0xff] }
  0x14   :  { %v143_v50 = vsel %vm72_vm0, %v18_v33, 0.0  ;;  %206 = vst.msk [vmem:[%s552_s1 + $0x28] sm:$0xff] %vm72_vm0, %v190_v39  ;;  %v191_v51 = vmul.f32 0.25, %v121_v40  ;;  %v128_v52 = vadd.f32 %v127_v34, %v126_v41  ;;  %v138_v54 = vadd.f32 %v137_v47, %v136_v38  ;;  %v67_v61 = vld [vmem:[%s551_s0 + $0x1d8] sm:$0xff]  ;;  %v52_v4 = vld [vmem:[%s551_s0 + $0x160] sm:$0xff]  ;;  %v53_v16 = vld [vmem:[%s551_s0 + $0x168] sm:$0xff] }
  0x15   :  { %v133_v53 = vadd.f32 %v132_v36, %v131_v42  ;;  %v141_v58 = vsel %vm72_vm0, %v65_v37, 0.0  ;;  %v144_v59 = vsel %vm72_vm0, %v34_v43, 0.0  ;;  %v146_v60 = vsel %vm72_vm0, %v50_v44, 0.0  ;;  %v68_v9 = vld [vmem:[%s551_s0 + $0x1e0] sm:$0xff]  ;;  %v22_v17 = vld [vmem:[%s551_s0 + $0x70] sm:$0xff]  ;;  %v69_v21 = vld [vmem:[%s551_s0 + $0x1e8] sm:$0xff] }
  0x16   :  { %v150_v62 = vsel %vm72_vm0, %v19_v45, 0.0  ;;  %207 = vst.msk [vmem:[%s552_s1 + $0x30] sm:$0xff] %vm72_vm0, %v191_v51  ;;  %v192_v63 = vmul.f32 0.25, %v128_v52  ;;  %v140_v1 = vadd.f32 %v139_v48, %v138_v54  ;;  %v145_v2 = vadd.f32 %v144_v59, %v143_v50  ;;  %v38_v27 = vld [vmem:[%s551_s0 + $0xf0] sm:$0xff]  ;;  %v23_v29 = vld [vmem:[%s551_s0 + $0x78] sm:$0xff] }
  0x17   :  { %v135_v0 = vadd.f32 %v134_v46, %v133_v53  ;;  %v148_v6 = vsel %vm72_vm0, %v66_v49, 0.0  ;;  %v151_v7 = vsel %vm72_vm0, %v35_v55, 0.0  ;;  %v153_v8 = vsel %vm72_vm0, %v51_v56, 0.0  ;;  %v54_v28 = vld [vmem:[%s551_s0 + $0x170] sm:$0xff]  ;;  %v39_v39 = vld [vmem:[%s551_s0 + $0xf8] sm:$0xff] }
  0x18   :  { %v157_v10 = vsel %vm72_vm0, %v20_v57, 0.0  ;;  %208 = vst.msk [vmem:[%s552_s1 + $0x38] sm:$0xff] %vm72_vm0, %v192_v63  ;;  %v142_v12 = vadd.f32 %v141_v58, %v140_v1  ;;  %v147_v13 = vadd.f32 %v146_v60, %v145_v2  ;;  %v152_v14 = vadd.f32 %v151_v7, %v150_v62  ;;  %v70_v38 = vld [vmem:[%s551_s0 + $0x1f0] sm:$0xff]  ;;  %v55_v40 = vld [vmem:[%s551_s0 + $0x178] sm:$0xff] }
  0x19   :  { %v193_v11 = vmul.f32 0.25, %v135_v0  ;;  %v155_v18 = vsel %vm72_vm0, %v67_v61, 0.0  ;;  %v158_v19 = vsel %vm72_vm0, %v36_v3, 0.0  ;;  %v160_v20 = vsel %vm72_vm0, %v52_v4, 0.0  ;;  %v71_v49 = vld [vmem:[%s551_s0 + $0x1f8] sm:$0xff] }
  0x1a   :  { %v164_v22 = vsel %vm72_vm0, %v21_v5, 0.0  ;;  %v194_v23 = vmul.f32 0.25, %v142_v12  ;;  %v149_v24 = vadd.f32 %v148_v6, %v147_v13  ;;  %v154_v25 = vadd.f32 %v153_v8, %v152_v14 }
  0x1b   :  { %209 = vst.msk [vmem:[%s552_s1 + $0x40] sm:$0xff] %vm72_vm0, %v193_v11  ;;  %v159_v26 = vadd.f32 %v158_v19, %v157_v10  ;;  %v162_v30 = vsel %vm72_vm0, %v68_v9, 0.0  ;;  %v165_v31 = vsel %vm72_vm0, %v37_v15, 0.0  ;;  %v167_v32 = vsel %vm72_vm0, %v53_v16, 0.0 }
  0x1c   :  { %v171_v33 = vsel %vm72_vm0, %v22_v17, 0.0  ;;  %210 = vst.msk [vmem:[%s552_s1 + $0x48] sm:$0xff] %vm72_vm0, %v194_v23  ;;  %v195_v34 = vmul.f32 0.25, %v149_v24  ;;  %v156_v35 = vadd.f32 %v155_v18, %v154_v25  ;;  %v166_v37 = vadd.f32 %v165_v31, %v164_v22 }
  0x1d   :  { %v161_v36 = vadd.f32 %v160_v20, %v159_v26  ;;  %v169_v41 = vsel %vm72_vm0, %v69_v21, 0.0  ;;  %v172_v42 = vsel %vm72_vm0, %v38_v27, 0.0  ;;  %v174_v43 = vsel %vm72_vm0, %v54_v28, 0.0 }
  0x1e   :  { %v178_v44 = vsel %vm72_vm0, %v23_v29, 0.0  ;;  %211 = vst.msk [vmem:[%s552_s1 + $0x50] sm:$0xff] %vm72_vm0, %v195_v34  ;;  %v196_v45 = vmul.f32 0.25, %v156_v35  ;;  %v168_v47 = vadd.f32 %v167_v32, %v166_v37  ;;  %v173_v48 = vadd.f32 %v172_v42, %v171_v33 }
  0x1f   :  { %v163_v46 = vadd.f32 %v162_v30, %v161_v36  ;;  %v176_v50 = vsel %vm72_vm0, %v70_v38, 0.0  ;;  %v179_v51 = vsel %vm72_vm0, %v39_v39, 0.0  ;;  %v181_v52 = vsel %vm72_vm0, %v55_v40, 0.0 }
  0x20   :  { %212 = vst.msk [vmem:[%s552_s1 + $0x58] sm:$0xff] %vm72_vm0, %v196_v45  ;;  %v170_v54 = vadd.f32 %v169_v41, %v168_v47  ;;  %v175_v55 = vadd.f32 %v174_v43, %v173_v48  ;;  %v180_v56 = vadd.f32 %v179_v51, %v178_v44  ;;  %v183_v57 = vsel %vm72_vm0, %v71_v49, 0.0 }
  0x21   :  { %v197_v53 = vmul.f32 0.25, %v163_v46 }
  0x22   :  { %v198_v58 = vmul.f32 0.25, %v170_v54  ;;  %v177_v59 = vadd.f32 %v176_v50, %v175_v55  ;;  %v182_v60 = vadd.f32 %v181_v52, %v180_v56 }
  0x23   :  { %213 = vst.msk [vmem:[%s552_s1 + $0x60] sm:$0xff] %vm72_vm0, %v197_v53 }
  0x24   :  { %214 = vst.msk [vmem:[%s552_s1 + $0x68] sm:$0xff] %vm72_vm0, %v198_v58  ;;  %v199_v61 = vmul.f32 0.25, %v177_v59  ;;  %v184_v62 = vadd.f32 %v183_v57, %v182_v60 }
  0x26   :  { %215 = vst.msk [vmem:[%s552_s1 + $0x70] sm:$0xff] %vm72_vm0, %v199_v61  ;;  %v200_v63 = vmul.f32 0.25, %v184_v62 }
  0x28   :  { %216 = vst.msk [vmem:[%s552_s1 + $0x78] sm:$0xff] %vm72_vm0, %v200_v63 }

// kernel: _lambda_.10
= control target key start
LH: loop header
LB: loop body
LE: loop exit
PB: predicated region body
PF: predicated region fallthrough
CT: control target
= control target key end

     0   :  { %vm35_vm0 = vcmask 293888   ;;  %vm84_vm1 = vcmask 1043456   ;;  %s565_s1 = inlined_call_operand.vmem [shape: f32[36,128], index: 1, kind: input, shape index: {}]   ;;  %s566_s0 = inlined_call_operand.vmem [shape: f32[128,36], index: 0, kind: input, shape index: {}]   ;;  %s567_s2 = inlined_call_operand.vmem [shape: f32[128,128], index: 2, kind: output, shape index: {0}]   ;;  %s568_s3 = inlined_call_operand.vmem [shape: f32[1,128], index: 3, kind: output, shape index: {1}]   ;;  %s569_s4 = inlined_call_operand.vmem [shape: f32[1,128], index: 4, kind: output, shape index: {2}]  }
   0x1   :  { %v30_v0 = vld [vmem:[%s565_s1] sm:$0xff]  ;;  %v31_v1 = vld [vmem:[%s565_s1 + $0x8] sm:$0xff]  ;;  %v32_v2 = vld [vmem:[%s565_s1 + $0x10] sm:$0xff] }
   0x2   :  { %v393_v3 = vpack.c.bf16 %v31_v1, %v30_v0  ;;  %v33_v4 = vld [vmem:[%s565_s1 + $0x18] sm:$0xff]  ;;  %v14_v5 = vld [vmem:[%s566_s0] sm:$0xff]  ;;  %v15_v9 = vld [vmem:[%s566_s0 + $0x8] sm:$0xff] }
   0x3   :  { %v397_v6 = vpack.c.bf16 %v33_v4, %v32_v2  ;;  %369 = vmatprep.mubr.msk.f32.mxu0 %vm35_vm0, %v14_v5  ;;  %v22_v7 = vld [vmem:[%s566_s0 + $0x40] sm:$0xff]  ;;  %v23_v10 = vld [vmem:[%s566_s0 + $0x48] sm:$0xff]  ;;  %v16_v11 = vld [vmem:[%s566_s0 + $0x10] sm:$0xff] }
   0x4   :  { %394 = vmatprep.subr.bf16.mxu0 %v393_v3  ;;  %401 = vmatprep.subr.bf16.mxu1 %v393_v3  ;;  %v34_v8 = vld [vmem:[%s565_s1 + $0x20] sm:$0xf]  ;;  %v24_v12 = vld [vmem:[%s566_s0 + $0x50] sm:$0xff]  ;;  %v17_v13 = vld [vmem:[%s566_s0 + $0x18] sm:$0xff] }
   0x5   :  { %396 = vmatpush3.bf16.msra.mxu0 %v393_v3  ;;  %404 = vmatpush3.bf16.msra.mxu1 %v393_v3  ;;  %v25_v14 = vld [vmem:[%s566_s0 + $0x58] sm:$0xff]  ;;  %v18_v15 = vld [vmem:[%s566_s0 + $0x20] sm:$0xff]  ;;  %v19_v17 = vld [vmem:[%s566_s0 + $0x28] sm:$0xff] }
   0x6   :  { %398 = vmatprep.subr.bf16.mxu0 %v397_v6  ;;  %402 = vmatprep.subr.bf16.mxu1 %v397_v6  ;;  %v26_v16 = vld [vmem:[%s566_s0 + $0x60] sm:$0xff]  ;;  %v27_v18 = vld [vmem:[%s566_s0 + $0x68] sm:$0xff]  ;;  %v20_v19 = vld [vmem:[%s566_s0 + $0x30] sm:$0xff] }
   0x7   :  { %381 = vmatprep.mubr.msk.f32.mxu1 %vm35_vm0, %v22_v7  ;;  %v28_v20 = vld [vmem:[%s566_s0 + $0x70] sm:$0xff]  ;;  %v21_v21 = vld [vmem:[%s566_s0 + $0x38] sm:$0xff] }
   0x8   :  { %v29_v22 = vld [vmem:[%s566_s0 + $0x78] sm:$0xff] }
   0x9   :  { %400 = vmatpush3.bf16.msra.mxu0 %v397_v6  ;;  %405 = vmatpush3.bf16.msra.mxu1 %v397_v6 }
   0xa   :  { %367 = vmatprep.subr.msk.mxu0 %vm84_vm1, %v34_v8  ;;  %403 = vmatprep.subr.msk.mxu1 %vm84_vm1, %v34_v8 }
   0xd   :  { %368 = vmatpush3.msk.msra.mxu0 %vm84_vm1, %v34_v8  ;;  %406 = vmatpush3.msk.msra.mxu1 %vm84_vm1, %v34_v8 }
   0xe   :  { %370 = vmatmul.mubr.msk.f32.vlgmr.msra.gmra.mrb[0].mxu0 %vm35_vm0, %v15_v9  ;;  %382 = vmatmul.mubr.msk.f32.vlgmr.msra.gmra.mrb[0].mxu1 %vm35_vm0, %v23_v10 }
   0xf   :  { %372 = vmatprep.mubr.msk.f32.mxu0 %vm35_vm0, %v16_v11  ;;  %384 = vmatprep.mubr.msk.f32.mxu1 %vm35_vm0, %v24_v12 }
  0x12   :  { %373 = vmatmul.mubr.msk.f32.gmra.mrb[2].mxu0 %vm35_vm0, %v17_v13  ;;  %385 = vmatmul.mubr.msk.f32.gmra.mrb[2].mxu1 %vm35_vm0, %v25_v14 }
  0x13   :  { %375 = vmatprep.mubr.msk.f32.mxu0 %vm35_vm0, %v18_v15  ;;  %387 = vmatprep.mubr.msk.f32.mxu1 %vm35_vm0, %v26_v16 }
  0x16   :  { %376 = vmatmul.mubr.msk.f32.gmra.mrb[4].mxu0 %vm35_vm0, %v19_v17  ;;  %388 = vmatmul.mubr.msk.f32.gmra.mrb[4].mxu1 %vm35_vm0, %v27_v18 }
  0x17   :  { %378 = vmatprep.mubr.msk.f32.mxu0 %vm35_vm0, %v20_v19  ;;  %390 = vmatprep.mubr.msk.f32.mxu1 %vm35_vm0, %v28_v20 }
  0x1a   :  { %379 = vmatmul.mubr.msk.f32.gmra.mrb[6].mxu0 %vm35_vm0, %v21_v21  ;;  %391 = vmatmul.mubr.msk.f32.gmra.mrb[6].mxu1 %vm35_vm0, %v29_v22 }
  0xe1   :  { %v371_v23 = vpop.f32.mrb[0].mxu0  ;;  %v383_v24 = vpop.f32.mrb[0].mxu1 }
  0xe2   :  { %234 = vst [vmem:[%s567_s2 + $0x8] sm:$0xff] %v371_v23  ;;  %v272_v25 = vmul.f32 %v371_v23, %v371_v23  ;;  %v154_v26 = vpop.f32.mrb[1].mxu0  ;;  %242 = vst [vmem:[%s567_s2 + $0x48] sm:$0xff] %v383_v24  ;;  %v194_v27 = vpop.f32.mrb[1].mxu1  ;;  %v280_v63 = vmul.f32 %v383_v24, %v383_v24 }
  0xe3   :  { %233 = vst [vmem:[%s567_s2] sm:$0xff] %v154_v26  ;;  %v249_v28 = vadd.f32 %v371_v23, %v154_v26  ;;  %v271_v29 = vmul.f32 %v154_v26, %v154_v26  ;;  %241 = vst [vmem:[%s567_s2 + $0x40] sm:$0xff] %v194_v27  ;;  %v279_v60 = vmul.f32 %v194_v27, %v194_v27 }
  0xe5   :  { %v287_v30 = vadd.f32 %v272_v25, %v271_v29  ;;  %v374_v31 = vpop.f32.mrb[2].mxu0  ;;  %v386_v32 = vpop.f32.mrb[2].mxu1 }
  0xe6   :  { %236 = vst [vmem:[%s567_s2 + $0x18] sm:$0xff] %v374_v31  ;;  %v164_v33 = vpop.f32.mrb[3].mxu0  ;;  %244 = vst [vmem:[%s567_s2 + $0x58] sm:$0xff] %v386_v32  ;;  %v204_v34 = vpop.f32.mrb[3].mxu1  ;;  %v274_v37 = vmul.f32 %v374_v31, %v374_v31  ;;  %v282_v5 = vmul.f32 %v386_v32, %v386_v32 }
  0xe7   :  { %235 = vst [vmem:[%s567_s2 + $0x10] sm:$0xff] %v164_v33  ;;  %v250_v35 = vadd.f32 %v249_v28, %v164_v33  ;;  %v273_v36 = vmul.f32 %v164_v33, %v164_v33  ;;  %243 = vst [vmem:[%s567_s2 + $0x50] sm:$0xff] %v204_v34  ;;  %v281_v2 = vmul.f32 %v204_v34, %v204_v34 }
  0xe9   :  { %v288_v38 = vadd.f32 %v287_v30, %v273_v36  ;;  %v377_v39 = vpop.f32.mrb[4].mxu0  ;;  %v251_v40 = vadd.f32 %v374_v31, %v250_v35  ;;  %v389_v41 = vpop.f32.mrb[4].mxu1 }
  0xea   :  { %238 = vst [vmem:[%s567_s2 + $0x28] sm:$0xff] %v377_v39  ;;  %v174_v42 = vpop.f32.mrb[5].mxu0  ;;  %246 = vst [vmem:[%s567_s2 + $0x68] sm:$0xff] %v389_v41  ;;  %v214_v43 = vpop.f32.mrb[5].mxu1  ;;  %v276_v47 = vmul.f32 %v377_v39, %v377_v39  ;;  %v284_v11 = vmul.f32 %v389_v41, %v389_v41 }
  0xeb   :  { %237 = vst [vmem:[%s567_s2 + $0x20] sm:$0xff] %v174_v42  ;;  %v252_v44 = vadd.f32 %v251_v40, %v174_v42  ;;  %v275_v45 = vmul.f32 %v174_v42, %v174_v42  ;;  %v289_v46 = vadd.f32 %v288_v38, %v274_v37  ;;  %245 = vst [vmem:[%s567_s2 + $0x60] sm:$0xff] %v214_v43 }
  0xec   :  { %v283_v8 = vmul.f32 %v214_v43, %v214_v43 }
  0xed   :  { %v290_v48 = vadd.f32 %v289_v46, %v275_v45  ;;  %v380_v49 = vpop.f32.mrb[6].mxu0  ;;  %v253_v50 = vadd.f32 %v377_v39, %v252_v44  ;;  %v392_v51 = vpop.f32.mrb[6].mxu1 }
  0xee   :  { %240 = vst [vmem:[%s567_s2 + $0x38] sm:$0xff] %v380_v49  ;;  %v184_v52 = vpop.f32.mrb[7].mxu0  ;;  %248 = vst [vmem:[%s567_s2 + $0x78] sm:$0xff] %v392_v51  ;;  %v224_v53 = vpop.f32.mrb[7].mxu1  ;;  %v278_v57 = vmul.f32 %v380_v49, %v380_v49  ;;  %v286_v17 = vmul.f32 %v392_v51, %v392_v51 }
  0xef   :  { %239 = vst [vmem:[%s567_s2 + $0x30] sm:$0xff] %v184_v52  ;;  %v254_v54 = vadd.f32 %v253_v50, %v184_v52  ;;  %v277_v55 = vmul.f32 %v184_v52, %v184_v52  ;;  %v291_v56 = vadd.f32 %v290_v48, %v276_v47  ;;  %247 = vst [vmem:[%s567_s2 + $0x70] sm:$0xff] %v224_v53 }
  0xf0   :  { %v285_v14 = vmul.f32 %v224_v53, %v224_v53 }
  0xf1   :  { %v255_v58 = vadd.f32 %v380_v49, %v254_v54  ;;  %v292_v59 = vadd.f32 %v291_v56, %v277_v55 }
  0xf3   :  { %v293_v61 = vadd.f32 %v292_v59, %v278_v57  ;;  %v256_v62 = vadd.f32 %v255_v58, %v194_v27 }
  0xf5   :  { %v294_v0 = vadd.f32 %v293_v61, %v279_v60  ;;  %v257_v1 = vadd.f32 %v383_v24, %v256_v62 }
  0xf7   :  { %v258_v3 = vadd.f32 %v257_v1, %v204_v34  ;;  %v295_v4 = vadd.f32 %v294_v0, %v280_v63 }
  0xf9   :  { %v296_v6 = vadd.f32 %v295_v4, %v281_v2  ;;  %v259_v7 = vadd.f32 %v386_v32, %v258_v3 }
  0xfb   :  { %v260_v9 = vadd.f32 %v259_v7, %v214_v43  ;;  %v297_v10 = vadd.f32 %v296_v6, %v282_v5 }
  0xfd   :  { %v298_v12 = vadd.f32 %v297_v10, %v283_v8  ;;  %v261_v13 = vadd.f32 %v389_v41, %v260_v9 }
  0xff   :  { %v262_v15 = vadd.f32 %v261_v13, %v224_v53  ;;  %v299_v16 = vadd.f32 %v298_v12, %v284_v11 }
 0x101   :  { %v263_v18 = vadd.f32 %v392_v51, %v262_v15  ;;  %v300_v19 = vadd.f32 %v299_v16, %v285_v14 }
 0x103   :  { %v264_v20 = vrot.slane %v263_v18, 4  ;;  %v301_v21 = vadd.f32 %v300_v19, %v286_v17 }
 0x105   :  { %v265_v22 = vadd.f32 %v264_v20, %v263_v18  ;;  %v302_v23 = vrot.slane %v301_v21, 4 }
 0x107   :  { %v266_v24 = vrot.slane %v265_v22, 2  ;;  %v303_v25 = vadd.f32 %v302_v23, %v301_v21 }
 0x109   :  { %v267_v26 = vadd.f32 %v266_v24, %v265_v22  ;;  %v304_v27 = vrot.slane %v303_v25, 2 }
 0x10b   :  { %v268_v28 = vrot.slane %v267_v26, 1  ;;  %v305_v29 = vadd.f32 %v304_v27, %v303_v25 }
 0x10d   :  { %v269_v30 = vadd.f32 %v268_v28, %v267_v26  ;;  %v306_v31 = vrot.slane %v305_v29, 1 }
 0x10f   :  { %270 = vst [vmem:[%s568_s3] sm:$0x1] %v269_v30  ;;  %v307_v32 = vadd.f32 %v306_v31, %v305_v29 }
 0x111   :  { %308 = vst [vmem:[%s569_s4] sm:$0x1] %v307_v32 }

// kernel: _lambda_.11
= control target key start
LH: loop header
LB: loop body
LE: loop exit
PB: predicated region body
PF: predicated region fallthrough
CT: control target
= control target key end

     0   :  { %s254_s0 = inlined_call_operand.vmem [shape: f32[128,128], index: 0, kind: input, shape index: {}]   ;;  %s255_s1 = inlined_call_operand.vmem [shape: f32[1,128], index: 1, kind: input, shape index: {}]   ;;  %s256_s2 = inlined_call_operand.vmem [shape: f32[1,128], index: 2, kind: input, shape index: {}]   ;;  %s257_s3 = inlined_call_operand.vmem [shape: f32[128,128], index: 3, kind: output, shape index: {}]  }
   0x1   :  { %v14_v0 = vld [vmem:[%s254_s0] sm:$0xff]  ;;  %v15_v4 = vld [vmem:[%s254_s0 + $0x8] sm:$0xff]  ;;  %v16_v5 = vld [vmem:[%s254_s0 + $0x10] sm:$0xff] }
   0x2   :  { %v112_v1 = vld [vmem:[%s255_s1] ss:$0 sm:$0xff]  ;;  %v17_v6 = vld [vmem:[%s254_s0 + $0x18] sm:$0xff]  ;;  %v19_v11 = vld [vmem:[%s254_s0 + $0x28] sm:$0xff] }
   0x3   :  { %v143_v2 = vld [vmem:[%s256_s2] ss:$0 sm:$0xff]  ;;  %v37_v3 = vmul.f32 %v112_v1, %v14_v0  ;;  %v38_v7 = vmul.f32 %v112_v1, %v15_v4  ;;  %v39_v8 = vmul.f32 %v112_v1, %v16_v5  ;;  %v40_v9 = vmul.f32 %v112_v1, %v17_v6  ;;  %v20_v12 = vld [vmem:[%s254_s0 + $0x30] sm:$0xff]  ;;  %v21_v17 = vld [vmem:[%s254_s0 + $0x38] sm:$0xff] }
   0x4   :  { %v18_v10 = vld [vmem:[%s254_s0 + $0x20] sm:$0xff]  ;;  %v42_v15 = vmul.f32 %v112_v1, %v19_v11  ;;  %v43_v16 = vmul.f32 %v112_v1, %v20_v12  ;;  %v44_v21 = vmul.f32 %v112_v1, %v21_v17  ;;  %v23_v27 = vld [vmem:[%s254_s0 + $0x48] sm:$0xff]  ;;  %v24_v28 = vld [vmem:[%s254_s0 + $0x50] sm:$0xff] }
   0x5   :  { %v60_v13 = vadd.f32 %v143_v2, %v37_v3  ;;  %v41_v14 = vmul.f32 %v112_v1, %v18_v10  ;;  %v61_v18 = vadd.f32 %v143_v2, %v38_v7  ;;  %v62_v19 = vadd.f32 %v143_v2, %v39_v8  ;;  %v22_v22 = vld [vmem:[%s254_s0 + $0x40] sm:$0xff]  ;;  %v25_v29 = vld [vmem:[%s254_s0 + $0x58] sm:$0xff]  ;;  %v27_v35 = vld [vmem:[%s254_s0 + $0x68] sm:$0xff] }
   0x6   :  { %v63_v20 = vadd.f32 %v143_v2, %v40_v9  ;;  %v65_v25 = vadd.f32 %v143_v2, %v42_v15  ;;  %v66_v26 = vadd.f32 %v143_v2, %v43_v16  ;;  %v67_v33 = vadd.f32 %v143_v2, %v44_v21  ;;  %v26_v34 = vld [vmem:[%s254_s0 + $0x60] sm:$0xff]  ;;  %v28_v36 = vld [vmem:[%s254_s0 + $0x70] sm:$0xff]  ;;  %v29_v41 = vld [vmem:[%s254_s0 + $0x78] sm:$0xff] }
   0x7   :  { %v76_v23 = vmax.f32 %v60_v13, 0.0  ;;  %v64_v24 = vadd.f32 %v143_v2, %v41_v14  ;;  %v77_v30 = vmax.f32 %v61_v18, 0.0  ;;  %v78_v31 = vmax.f32 %v62_v19, 0.0 }
   0x8   :  { %v79_v32 = vmax.f32 %v63_v20, 0.0  ;;  %v81_v38 = vmax.f32 %v65_v25, 0.0  ;;  %v82_v39 = vmax.f32 %v66_v26, 0.0  ;;  %v45_v40 = vmul.f32 %v112_v1, %v22_v22 }
   0x9   :  { %92 = vst [vmem:[%s257_s3] sm:$0xff] %v76_v23  ;;  %v80_v37 = vmax.f32 %v64_v24, 0.0  ;;  %93 = vst [vmem:[%s257_s3 + $0x8] sm:$0xff] %v77_v30  ;;  %v83_v42 = vmax.f32 %v67_v33, 0.0  ;;  %v46_v43 = vmul.f32 %v112_v1, %v23_v27  ;;  %v47_v44 = vmul.f32 %v112_v1, %v24_v28 }
   0xa   :  { %94 = vst [vmem:[%s257_s3 + $0x10] sm:$0xff] %v78_v31  ;;  %95 = vst [vmem:[%s257_s3 + $0x18] sm:$0xff] %v79_v32  ;;  %v48_v45 = vmul.f32 %v112_v1, %v25_v29  ;;  %v68_v46 = vadd.f32 %v143_v2, %v45_v40  ;;  %v49_v47 = vmul.f32 %v112_v1, %v26_v34 }
   0xb   :  { %96 = vst [vmem:[%s257_s3 + $0x20] sm:$0xff] %v80_v37  ;;  %97 = vst [vmem:[%s257_s3 + $0x28] sm:$0xff] %v81_v38  ;;  %v50_v48 = vmul.f32 %v112_v1, %v27_v35  ;;  %v51_v49 = vmul.f32 %v112_v1, %v28_v36  ;;  %v69_v50 = vadd.f32 %v143_v2, %v46_v43 }
   0xc   :  { %98 = vst [vmem:[%s257_s3 + $0x30] sm:$0xff] %v82_v39  ;;  %99 = vst [vmem:[%s257_s3 + $0x38] sm:$0xff] %v83_v42  ;;  %v70_v51 = vadd.f32 %v143_v2, %v47_v44  ;;  %v71_v52 = vadd.f32 %v143_v2, %v48_v45  ;;  %v52_v53 = vmul.f32 %v112_v1, %v29_v41  ;;  %v84_v54 = vmax.f32 %v68_v46, 0.0 }
   0xd   :  { %v72_v55 = vadd.f32 %v143_v2, %v49_v47  ;;  %v73_v56 = vadd.f32 %v143_v2, %v50_v48  ;;  %v74_v57 = vadd.f32 %v143_v2, %v51_v49  ;;  %v85_v58 = vmax.f32 %v69_v50, 0.0 }
   0xe   :  { %v86_v59 = vmax.f32 %v70_v51, 0.0  ;;  %v87_v60 = vmax.f32 %v71_v52, 0.0  ;;  %v75_v61 = vadd.f32 %v143_v2, %v52_v53  ;;  %100 = vst [vmem:[%s257_s3 + $0x40] sm:$0xff] %v84_v54 }
   0xf   :  { %v88_v62 = vmax.f32 %v72_v55, 0.0  ;;  %v89_v63 = vmax.f32 %v73_v56, 0.0  ;;  %v90_v0 = vmax.f32 %v74_v57, 0.0  ;;  %101 = vst [vmem:[%s257_s3 + $0x48] sm:$0xff] %v85_v58 }
  0x10   :  { %102 = vst [vmem:[%s257_s3 + $0x50] sm:$0xff] %v86_v59  ;;  %103 = vst [vmem:[%s257_s3 + $0x58] sm:$0xff] %v87_v60  ;;  %v91_v1 = vmax.f32 %v75_v61, 0.0 }
  0x11   :  { %104 = vst [vmem:[%s257_s3 + $0x60] sm:$0xff] %v88_v62  ;;  %105 = vst [vmem:[%s257_s3 + $0x68] sm:$0xff] %v89_v63 }
  0x12   :  { %106 = vst [vmem:[%s257_s3 + $0x70] sm:$0xff] %v90_v0  ;;  %107 = vst [vmem:[%s257_s3 + $0x78] sm:$0xff] %v91_v1 }

// kernel: _lambda_.12
= control target key start
LH: loop header
LB: loop body
LE: loop exit
PB: predicated region body
PF: predicated region fallthrough
CT: control target
= control target key end

     0   :  { %vm37_vm0 = vcmask 441344   ;;  %vm86_vm1 = vcmask 1045504   ;;  %s585_s1 = inlined_call_operand.vmem [shape: f32[54,128], index: 1, kind: input, shape index: {}]   ;;  %s586_s0 = inlined_call_operand.vmem [shape: f32[128,54], index: 0, kind: input, shape index: {}]   ;;  %s587_s2 = inlined_call_operand.vmem [shape: f32[128,128], index: 2, kind: output, shape index: {0}]   ;;  %s588_s3 = inlined_call_operand.vmem [shape: f32[1,128], index: 3, kind: output, shape index: {1}]   ;;  %s589_s4 = inlined_call_operand.vmem [shape: f32[1,128], index: 4, kind: output, shape index: {2}]  }
   0x1   :  { %v30_v0 = vld [vmem:[%s585_s1] sm:$0xff]  ;;  %v31_v1 = vld [vmem:[%s585_s1 + $0x8] sm:$0xff]  ;;  %v32_v2 = vld [vmem:[%s585_s1 + $0x10] sm:$0xff] }
   0x2   :  { %v401_v3 = vpack.c.bf16 %v31_v1, %v30_v0  ;;  %v33_v4 = vld [vmem:[%s585_s1 + $0x18] sm:$0xff]  ;;  %v34_v6 = vld [vmem:[%s585_s1 + $0x20] sm:$0xff]  ;;  %v35_v7 = vld [vmem:[%s585_s1 + $0x28] sm:$0xff] }
   0x3   :  { %v405_v5 = vpack.c.bf16 %v33_v4, %v32_v2  ;;  %v14_v8 = vld [vmem:[%s586_s0] sm:$0xff]  ;;  %v409_v9 = vpack.c.bf16 %v35_v7, %v34_v6  ;;  %v36_v11 = vld [vmem:[%s585_s1 + $0x30] sm:$0x3f]  ;;  %v15_v12 = vld [vmem:[%s586_s0 + $0x8] sm:$0xff] }
   0x4   :  { %402 = vmatprep.subr.bf16.mxu0 %v401_v3  ;;  %377 = vmatprep.mubr.msk.f32.mxu0 %vm37_vm0, %v14_v8  ;;  %v22_v10 = vld [vmem:[%s586_s0 + $0x40] sm:$0xff]  ;;  %v16_v13 = vld [vmem:[%s586_s0 + $0x10] sm:$0xff]  ;;  %v23_v14 = vld [vmem:[%s586_s0 + $0x48] sm:$0xff] }
   0x5   :  { %404 = vmatpush3.bf16.msra.mxu0 %v401_v3  ;;  %413 = vmatprep.subr.bf16.mxu1 %v401_v3  ;;  %v24_v15 = vld [vmem:[%s586_s0 + $0x50] sm:$0xff]  ;;  %v17_v16 = vld [vmem:[%s586_s0 + $0x18] sm:$0xff]  ;;  %v18_v17 = vld [vmem:[%s586_s0 + $0x20] sm:$0xff] }
   0x6   :  { %406 = vmatprep.subr.bf16.mxu0 %v405_v5  ;;  %417 = vmatpush3.bf16.msra.mxu1 %v401_v3  ;;  %v25_v18 = vld [vmem:[%s586_s0 + $0x58] sm:$0xff]  ;;  %v26_v19 = vld [vmem:[%s586_s0 + $0x60] sm:$0xff]  ;;  %v19_v20 = vld [vmem:[%s586_s0 + $0x28] sm:$0xff] }
   0x7   :  { %414 = vmatprep.subr.bf16.mxu1 %v405_v5  ;;  %389 = vmatprep.mubr.msk.f32.mxu1 %vm37_vm0, %v22_v10  ;;  %v20_v21 = vld [vmem:[%s586_s0 + $0x30] sm:$0xff]  ;;  %v27_v22 = vld [vmem:[%s586_s0 + $0x68] sm:$0xff]  ;;  %v21_v24 = vld [vmem:[%s586_s0 + $0x38] sm:$0xff] }
   0x8   :  { %v28_v23 = vld [vmem:[%s586_s0 + $0x70] sm:$0xff]  ;;  %v29_v25 = vld [vmem:[%s586_s0 + $0x78] sm:$0xff] }
   0x9   :  { %408 = vmatpush3.bf16.msra.mxu0 %v405_v5 }
   0xa   :  { %410 = vmatprep.subr.bf16.mxu0 %v409_v9  ;;  %418 = vmatpush3.bf16.msra.mxu1 %v405_v5 }
   0xb   :  { %415 = vmatprep.subr.bf16.mxu1 %v409_v9 }
   0xd   :  { %412 = vmatpush3.bf16.msra.mxu0 %v409_v9 }
   0xe   :  { %375 = vmatprep.subr.msk.mxu0 %vm86_vm1, %v36_v11  ;;  %419 = vmatpush3.bf16.msra.mxu1 %v409_v9 }
   0xf   :  { %416 = vmatprep.subr.msk.mxu1 %vm86_vm1, %v36_v11 }
  0x11   :  { %376 = vmatpush3.msk.msra.mxu0 %vm86_vm1, %v36_v11 }
  0x12   :  { %378 = vmatmul.mubr.msk.f32.vlgmr.msra.gmra.mrb[0].mxu0 %vm37_vm0, %v15_v12  ;;  %420 = vmatpush3.msk.msra.mxu1 %vm86_vm1, %v36_v11 }
  0x13   :  { %380 = vmatprep.mubr.msk.f32.mxu0 %vm37_vm0, %v16_v13  ;;  %390 = vmatmul.mubr.msk.f32.vlgmr.msra.gmra.mrb[0].mxu1 %vm37_vm0, %v23_v14 }
  0x14   :  { %392 = vmatprep.mubr.msk.f32.mxu1 %vm37_vm0, %v24_v15 }
  0x16   :  { %381 = vmatmul.mubr.msk.f32.gmra.mrb[2].mxu0 %vm37_vm0, %v17_v16 }
  0x17   :  { %383 = vmatprep.mubr.msk.f32.mxu0 %vm37_vm0, %v18_v17  ;;  %393 = vmatmul.mubr.msk.f32.gmra.mrb[2].mxu1 %vm37_vm0, %v25_v18 }
  0x18   :  { %395 = vmatprep.mubr.msk.f32.mxu1 %vm37_vm0, %v26_v19 }
  0x1a   :  { %384 = vmatmul.mubr.msk.f32.gmra.mrb[4].mxu0 %vm37_vm0, %v19_v20 }
  0x1b   :  { %386 = vmatprep.mubr.msk.f32.mxu0 %vm37_vm0, %v20_v21  ;;  %396 = vmatmul.mubr.msk.f32.gmra.mrb[4].mxu1 %vm37_vm0, %v27_v22 }
  0x1c   :  { %398 = vmatprep.mubr.msk.f32.mxu1 %vm37_vm0, %v28_v23 }
  0x1e   :  { %387 = vmatmul.mubr.msk.f32.gmra.mrb[6].mxu0 %vm37_vm0, %v21_v24 }
  0x1f   :  { %399 = vmatmul.mubr.msk.f32.gmra.mrb[6].mxu1 %vm37_vm0, %v29_v25 }
  0xe5   :  { %v379_v26 = vpop.f32.mrb[0].mxu0 }
  0xe6   :  { %236 = vst [vmem:[%s587_s2 + $0x8] sm:$0xff] %v379_v26  ;;  %v274_v27 = vmul.f32 %v379_v26, %v379_v26  ;;  %v156_v28 = vpop.f32.mrb[1].mxu0  ;;  %v391_v29 = vpop.f32.mrb[0].mxu1 }
  0xe7   :  { %235 = vst [vmem:[%s587_s2] sm:$0xff] %v156_v28  ;;  %v251_v30 = vadd.f32 %v379_v26, %v156_v28  ;;  %v273_v31 = vmul.f32 %v156_v28, %v156_v28  ;;  %244 = vst [vmem:[%s587_s2 + $0x48] sm:$0xff] %v391_v29  ;;  %v196_v32 = vpop.f32.mrb[1].mxu1  ;;  %v282_v2 = vmul.f32 %v391_v29, %v391_v29 }
  0xe8   :  { %243 = vst [vmem:[%s587_s2 + $0x40] sm:$0xff] %v196_v32  ;;  %v281_v63 = vmul.f32 %v196_v32, %v196_v32 }
  0xe9   :  { %v289_v33 = vadd.f32 %v274_v27, %v273_v31  ;;  %v382_v34 = vpop.f32.mrb[2].mxu0 }
  0xea   :  { %238 = vst [vmem:[%s587_s2 + $0x18] sm:$0xff] %v382_v34  ;;  %v166_v35 = vpop.f32.mrb[3].mxu0  ;;  %v394_v36 = vpop.f32.mrb[2].mxu1  ;;  %v276_v40 = vmul.f32 %v382_v34, %v382_v34 }
  0xeb   :  { %237 = vst [vmem:[%s587_s2 + $0x10] sm:$0xff] %v166_v35  ;;  %v252_v37 = vadd.f32 %v251_v30, %v166_v35  ;;  %v275_v38 = vmul.f32 %v166_v35, %v166_v35  ;;  %246 = vst [vmem:[%s587_s2 + $0x58] sm:$0xff] %v394_v36  ;;  %v206_v39 = vpop.f32.mrb[3].mxu1  ;;  %v284_v8 = vmul.f32 %v394_v36, %v394_v36 }
  0xec   :  { %245 = vst [vmem:[%s587_s2 + $0x50] sm:$0xff] %v206_v39  ;;  %v283_v5 = vmul.f32 %v206_v39, %v206_v39 }
  0xed   :  { %v290_v41 = vadd.f32 %v289_v33, %v275_v38  ;;  %v385_v42 = vpop.f32.mrb[4].mxu0  ;;  %v253_v43 = vadd.f32 %v382_v34, %v252_v37 }
  0xee   :  { %240 = vst [vmem:[%s587_s2 + $0x28] sm:$0xff] %v385_v42  ;;  %v176_v44 = vpop.f32.mrb[5].mxu0  ;;  %v397_v45 = vpop.f32.mrb[4].mxu1  ;;  %v278_v50 = vmul.f32 %v385_v42, %v385_v42 }
  0xef   :  { %239 = vst [vmem:[%s587_s2 + $0x20] sm:$0xff] %v176_v44  ;;  %v254_v46 = vadd.f32 %v253_v43, %v176_v44  ;;  %v277_v47 = vmul.f32 %v176_v44, %v176_v44  ;;  %v291_v48 = vadd.f32 %v290_v41, %v276_v40  ;;  %248 = vst [vmem:[%s587_s2 + $0x68] sm:$0xff] %v397_v45  ;;  %v216_v49 = vpop.f32.mrb[5].mxu1 }
  0xf0   :  { %247 = vst [vmem:[%s587_s2 + $0x60] sm:$0xff] %v216_v49  ;;  %v285_v11 = vmul.f32 %v216_v49, %v216_v49  ;;  %v286_v14 = vmul.f32 %v397_v45, %v397_v45 }
  0xf1   :  { %v292_v51 = vadd.f32 %v291_v48, %v277_v47  ;;  %v388_v52 = vpop.f32.mrb[6].mxu0  ;;  %v255_v53 = vadd.f32 %v385_v42, %v254_v46 }
  0xf2   :  { %242 = vst [vmem:[%s587_s2 + $0x38] sm:$0xff] %v388_v52  ;;  %v186_v54 = vpop.f32.mrb[7].mxu0  ;;  %v400_v55 = vpop.f32.mrb[6].mxu1  ;;  %v280_v60 = vmul.f32 %v388_v52, %v388_v52 }
  0xf3   :  { %241 = vst [vmem:[%s587_s2 + $0x30] sm:$0xff] %v186_v54  ;;  %v256_v56 = vadd.f32 %v255_v53, %v186_v54  ;;  %v279_v57 = vmul.f32 %v186_v54, %v186_v54  ;;  %v293_v58 = vadd.f32 %v292_v51, %v278_v50  ;;  %250 = vst [vmem:[%s587_s2 + $0x78] sm:$0xff] %v400_v55  ;;  %v226_v59 = vpop.f32.mrb[7].mxu1 }
  0xf4   :  { %249 = vst [vmem:[%s587_s2 + $0x70] sm:$0xff] %v226_v59  ;;  %v287_v17 = vmul.f32 %v226_v59, %v226_v59  ;;  %v288_v20 = vmul.f32 %v400_v55, %v400_v55 }
  0xf5   :  { %v257_v61 = vadd.f32 %v388_v52, %v256_v56  ;;  %v294_v62 = vadd.f32 %v293_v58, %v279_v57 }
  0xf7   :  { %v295_v0 = vadd.f32 %v294_v62, %v280_v60  ;;  %v258_v1 = vadd.f32 %v257_v61, %v196_v32 }
  0xf9   :  { %v296_v3 = vadd.f32 %v295_v0, %v281_v63  ;;  %v259_v4 = vadd.f32 %v391_v29, %v258_v1 }
  0xfb   :  { %v260_v6 = vadd.f32 %v259_v4, %v206_v39  ;;  %v297_v7 = vadd.f32 %v296_v3, %v282_v2 }
  0xfd   :  { %v298_v9 = vadd.f32 %v297_v7, %v283_v5  ;;  %v261_v10 = vadd.f32 %v394_v36, %v260_v6 }
  0xff   :  { %v262_v12 = vadd.f32 %v261_v10, %v216_v49  ;;  %v299_v13 = vadd.f32 %v298_v9, %v284_v8 }
 0x101   :  { %v300_v15 = vadd.f32 %v299_v13, %v285_v11  ;;  %v263_v16 = vadd.f32 %v397_v45, %v262_v12 }
 0x103   :  { %v264_v18 = vadd.f32 %v263_v16, %v226_v59  ;;  %v301_v19 = vadd.f32 %v300_v15, %v286_v14 }
 0x105   :  { %v265_v21 = vadd.f32 %v400_v55, %v264_v18  ;;  %v302_v22 = vadd.f32 %v301_v19, %v287_v17 }
 0x107   :  { %v266_v23 = vrot.slane %v265_v21, 4  ;;  %v303_v24 = vadd.f32 %v302_v22, %v288_v20 }
 0x109   :  { %v267_v25 = vadd.f32 %v266_v23, %v265_v21  ;;  %v304_v26 = vrot.slane %v303_v24, 4 }
 0x10b   :  { %v268_v27 = vrot.slane %v267_v25, 2  ;;  %v305_v28 = vadd.f32 %v304_v26, %v303_v24 }
 0x10d   :  { %v269_v29 = vadd.f32 %v268_v27, %v267_v25  ;;  %v306_v30 = vrot.slane %v305_v28, 2 }
 0x10f   :  { %v270_v31 = vrot.slane %v269_v29, 1  ;;  %v307_v32 = vadd.f32 %v306_v30, %v305_v28 }
 0x111   :  { %v271_v33 = vadd.f32 %v270_v31, %v269_v29  ;;  %v308_v34 = vrot.slane %v307_v32, 1 }
 0x113   :  { %272 = vst [vmem:[%s588_s3] sm:$0x1] %v271_v33  ;;  %v309_v35 = vadd.f32 %v308_v34, %v307_v32 }
 0x115   :  { %310 = vst [vmem:[%s589_s4] sm:$0x1] %v309_v35 }

// kernel: _lambda_.14
= control target key start
LH: loop header
LB: loop body
LE: loop exit
PB: predicated region body
PF: predicated region fallthrough
CT: control target
= control target key end

     0   :  { %vm39_vm0 = vcmask 588800   ;;  %s600_s1 = inlined_call_operand.vmem [shape: f32[72,128], index: 1, kind: input, shape index: {}]   ;;  %s601_s0 = inlined_call_operand.vmem [shape: f32[128,72], index: 0, kind: input, shape index: {}]   ;;  %s602_s2 = inlined_call_operand.vmem [shape: f32[128,128], index: 2, kind: output, shape index: {0}]   ;;  %s603_s3 = inlined_call_operand.vmem [shape: f32[1,128], index: 3, kind: output, shape index: {1}]   ;;  %s604_s4 = inlined_call_operand.vmem [shape: f32[1,128], index: 4, kind: output, shape index: {2}]  }
   0x1   :  { %v30_v0 = vld [vmem:[%s600_s1] sm:$0xff]  ;;  %v31_v1 = vld [vmem:[%s600_s1 + $0x8] sm:$0xff]  ;;  %v32_v2 = vld [vmem:[%s600_s1 + $0x10] sm:$0xff] }
   0x2   :  { %v404_v3 = vpack.c.bf16 %v31_v1, %v30_v0  ;;  %v33_v4 = vld [vmem:[%s600_s1 + $0x18] sm:$0xff]  ;;  %v34_v6 = vld [vmem:[%s600_s1 + $0x20] sm:$0xff]  ;;  %v35_v7 = vld [vmem:[%s600_s1 + $0x28] sm:$0xff] }
   0x3   :  { %v408_v5 = vpack.c.bf16 %v33_v4, %v32_v2  ;;  %v14_v8 = vld [vmem:[%s601_s0] sm:$0xff]  ;;  %v412_v9 = vpack.c.bf16 %v35_v7, %v34_v6  ;;  %v36_v11 = vld [vmem:[%s600_s1 + $0x30] sm:$0xff]  ;;  %v37_v12 = vld [vmem:[%s600_s1 + $0x38] sm:$0xff] }
   0x4   :  { %405 = vmatprep.subr.bf16.mxu0 %v404_v3  ;;  %420 = vmatprep.subr.bf16.mxu1 %v404_v3  ;;  %v22_v10 = vld [vmem:[%s601_s0 + $0x40] sm:$0xff]  ;;  %v416_v13 = vpack.c.bf16 %v37_v12, %v36_v11  ;;  %v15_v15 = vld [vmem:[%s601_s0 + $0x8] sm:$0xff]  ;;  %v16_v17 = vld [vmem:[%s601_s0 + $0x10] sm:$0xff] }
   0x5   :  { %407 = vmatpush3.bf16.msra.mxu0 %v404_v3  ;;  %425 = vmatpush3.bf16.msra.mxu1 %v404_v3  ;;  %v38_v14 = vld [vmem:[%s600_s1 + $0x40] sm:$0xff]  ;;  %v23_v16 = vld [vmem:[%s601_s0 + $0x48] sm:$0xff]  ;;  %v24_v18 = vld [vmem:[%s601_s0 + $0x50] sm:$0xff] }
   0x6   :  { %409 = vmatprep.subr.bf16.mxu0 %v408_v5  ;;  %380 = vmatprep.mubr.msk.f32.mxu0 %vm39_vm0, %v14_v8  ;;  %v17_v19 = vld [vmem:[%s601_s0 + $0x18] sm:$0xff]  ;;  %v18_v21 = vld [vmem:[%s601_s0 + $0x20] sm:$0xff]  ;;  %v19_v23 = vld [vmem:[%s601_s0 + $0x28] sm:$0xff] }
   0x7   :  { %421 = vmatprep.subr.bf16.mxu1 %v408_v5  ;;  %392 = vmatprep.mubr.msk.f32.mxu1 %vm39_vm0, %v22_v10  ;;  %v25_v20 = vld [vmem:[%s601_s0 + $0x58] sm:$0xff]  ;;  %v26_v22 = vld [vmem:[%s601_s0 + $0x60] sm:$0xff]  ;;  %v27_v24 = vld [vmem:[%s601_s0 + $0x68] sm:$0xff] }
   0x8   :  { %v20_v25 = vld [vmem:[%s601_s0 + $0x30] sm:$0xff]  ;;  %v21_v27 = vld [vmem:[%s601_s0 + $0x38] sm:$0xff] }
   0x9   :  { %411 = vmatpush3.bf16.msra.mxu0 %v408_v5  ;;  %426 = vmatpush3.bf16.msra.mxu1 %v408_v5  ;;  %v28_v26 = vld [vmem:[%s601_s0 + $0x70] sm:$0xff]  ;;  %v29_v28 = vld [vmem:[%s601_s0 + $0x78] sm:$0xff] }
   0xa   :  { %413 = vmatprep.subr.bf16.mxu0 %v412_v9  ;;  %422 = vmatprep.subr.bf16.mxu1 %v412_v9 }
   0xd   :  { %415 = vmatpush3.bf16.msra.mxu0 %v412_v9  ;;  %427 = vmatpush3.bf16.msra.mxu1 %v412_v9 }
   0xe   :  { %417 = vmatprep.subr.bf16.mxu0 %v416_v13  ;;  %423 = vmatprep.subr.bf16.mxu1 %v416_v13 }
  0x11   :  { %419 = vmatpush3.bf16.msra.mxu0 %v416_v13  ;;  %428 = vmatpush3.bf16.msra.mxu1 %v416_v13 }
  0x12   :  { %378 = vmatprep.subr.mxu0 %v38_v14  ;;  %424 = vmatprep.subr.mxu1 %v38_v14 }
  0x15   :  { %379 = vmatpush3.msra.mxu0 %v38_v14  ;;  %429 = vmatpush3.msra.mxu1 %v38_v14 }
  0x16   :  { %381 = vmatmul.mubr.msk.f32.vlgmr.msra.gmra.mrb[0].mxu0 %vm39_vm0, %v15_v15  ;;  %393 = vmatmul.mubr.msk.f32.vlgmr.msra.gmra.mrb[0].mxu1 %vm39_vm0, %v23_v16 }
  0x17   :  { %383 = vmatprep.mubr.msk.f32.mxu0 %vm39_vm0, %v16_v17  ;;  %395 = vmatprep.mubr.msk.f32.mxu1 %vm39_vm0, %v24_v18 }
  0x1a   :  { %384 = vmatmul.mubr.msk.f32.gmra.mrb[2].mxu0 %vm39_vm0, %v17_v19  ;;  %396 = vmatmul.mubr.msk.f32.gmra.mrb[2].mxu1 %vm39_vm0, %v25_v20 }
  0x1b   :  { %386 = vmatprep.mubr.msk.f32.mxu0 %vm39_vm0, %v18_v21  ;;  %398 = vmatprep.mubr.msk.f32.mxu1 %vm39_vm0, %v26_v22 }
  0x1e   :  { %387 = vmatmul.mubr.msk.f32.gmra.mrb[4].mxu0 %vm39_vm0, %v19_v23  ;;  %399 = vmatmul.mubr.msk.f32.gmra.mrb[4].mxu1 %vm39_vm0, %v27_v24 }
  0x1f   :  { %389 = vmatprep.mubr.msk.f32.mxu0 %vm39_vm0, %v20_v25  ;;  %401 = vmatprep.mubr.msk.f32.mxu1 %vm39_vm0, %v28_v26 }
  0x22   :  { %390 = vmatmul.mubr.msk.f32.gmra.mrb[6].mxu0 %vm39_vm0, %v21_v27  ;;  %402 = vmatmul.mubr.msk.f32.gmra.mrb[6].mxu1 %vm39_vm0, %v29_v28 }
  0xe9   :  { %v382_v29 = vpop.f32.mrb[0].mxu0  ;;  %v394_v30 = vpop.f32.mrb[0].mxu1 }
  0xea   :  { %234 = vst [vmem:[%s602_s2 + $0x8] sm:$0xff] %v382_v29  ;;  %v272_v31 = vmul.f32 %v382_v29, %v382_v29  ;;  %v154_v32 = vpop.f32.mrb[1].mxu0  ;;  %242 = vst [vmem:[%s602_s2 + $0x48] sm:$0xff] %v394_v30  ;;  %v194_v33 = vpop.f32.mrb[1].mxu1  ;;  %v280_v5 = vmul.f32 %v394_v30, %v394_v30 }
  0xeb   :  { %233 = vst [vmem:[%s602_s2] sm:$0xff] %v154_v32  ;;  %v249_v34 = vadd.f32 %v382_v29, %v154_v32  ;;  %v271_v35 = vmul.f32 %v154_v32, %v154_v32  ;;  %241 = vst [vmem:[%s602_s2 + $0x40] sm:$0xff] %v194_v33  ;;  %v279_v2 = vmul.f32 %v194_v33, %v194_v33 }
  0xed   :  { %v287_v36 = vadd.f32 %v272_v31, %v271_v35  ;;  %v385_v37 = vpop.f32.mrb[2].mxu0  ;;  %v397_v38 = vpop.f32.mrb[2].mxu1 }
  0xee   :  { %236 = vst [vmem:[%s602_s2 + $0x18] sm:$0xff] %v385_v37  ;;  %v164_v39 = vpop.f32.mrb[3].mxu0  ;;  %244 = vst [vmem:[%s602_s2 + $0x58] sm:$0xff] %v397_v38  ;;  %v204_v40 = vpop.f32.mrb[3].mxu1  ;;  %v274_v43 = vmul.f32 %v385_v37, %v385_v37  ;;  %v282_v11 = vmul.f32 %v397_v38, %v397_v38 }
  0xef   :  { %235 = vst [vmem:[%s602_s2 + $0x10] sm:$0xff] %v164_v39  ;;  %v250_v41 = vadd.f32 %v249_v34, %v164_v39  ;;  %v273_v42 = vmul.f32 %v164_v39, %v164_v39  ;;  %243 = vst [vmem:[%s602_s2 + $0x50] sm:$0xff] %v204_v40  ;;  %v281_v8 = vmul.f32 %v204_v40, %v204_v40 }
  0xf1   :  { %v288_v44 = vadd.f32 %v287_v36, %v273_v42  ;;  %v388_v45 = vpop.f32.mrb[4].mxu0  ;;  %v251_v46 = vadd.f32 %v385_v37, %v250_v41  ;;  %v400_v47 = vpop.f32.mrb[4].mxu1 }
  0xf2   :  { %238 = vst [vmem:[%s602_s2 + $0x28] sm:$0xff] %v388_v45  ;;  %v174_v48 = vpop.f32.mrb[5].mxu0  ;;  %246 = vst [vmem:[%s602_s2 + $0x68] sm:$0xff] %v400_v47  ;;  %v214_v49 = vpop.f32.mrb[5].mxu1  ;;  %v276_v53 = vmul.f32 %v388_v45, %v388_v45  ;;  %v284_v17 = vmul.f32 %v400_v47, %v400_v47 }
  0xf3   :  { %237 = vst [vmem:[%s602_s2 + $0x20] sm:$0xff] %v174_v48  ;;  %v252_v50 = vadd.f32 %v251_v46, %v174_v48  ;;  %v275_v51 = vmul.f32 %v174_v48, %v174_v48  ;;  %v289_v52 = vadd.f32 %v288_v44, %v274_v43  ;;  %245 = vst [vmem:[%s602_s2 + $0x60] sm:$0xff] %v214_v49 }
  0xf4   :  { %v283_v14 = vmul.f32 %v214_v49, %v214_v49 }
  0xf5   :  { %v290_v54 = vadd.f32 %v289_v52, %v275_v51  ;;  %v391_v55 = vpop.f32.mrb[6].mxu0  ;;  %v253_v56 = vadd.f32 %v388_v45, %v252_v50  ;;  %v403_v57 = vpop.f32.mrb[6].mxu1 }
  0xf6   :  { %240 = vst [vmem:[%s602_s2 + $0x38] sm:$0xff] %v391_v55  ;;  %v184_v58 = vpop.f32.mrb[7].mxu0  ;;  %248 = vst [vmem:[%s602_s2 + $0x78] sm:$0xff] %v403_v57  ;;  %v224_v59 = vpop.f32.mrb[7].mxu1  ;;  %v278_v63 = vmul.f32 %v391_v55, %v391_v55  ;;  %v286_v23 = vmul.f32 %v403_v57, %v403_v57 }
  0xf7   :  { %239 = vst [vmem:[%s602_s2 + $0x30] sm:$0xff] %v184_v58  ;;  %v254_v60 = vadd.f32 %v253_v56, %v184_v58  ;;  %v277_v61 = vmul.f32 %v184_v58, %v184_v58  ;;  %v291_v62 = vadd.f32 %v290_v54, %v276_v53  ;;  %247 = vst [vmem:[%s602_s2 + $0x70] sm:$0xff] %v224_v59 }
  0xf8   :  { %v285_v20 = vmul.f32 %v224_v59, %v224_v59 }
  0xf9   :  { %v255_v0 = vadd.f32 %v391_v55, %v254_v60  ;;  %v292_v1 = vadd.f32 %v291_v62, %v277_v61 }
  0xfb   :  { %v293_v3 = vadd.f32 %v292_v1, %v278_v63  ;;  %v256_v4 = vadd.f32 %v255_v0, %v194_v33 }
  0xfd   :  { %v294_v6 = vadd.f32 %v293_v3, %v279_v2  ;;  %v257_v7 = vadd.f32 %v394_v30, %v256_v4 }
  0xff   :  { %v258_v9 = vadd.f32 %v257_v7, %v204_v40  ;;  %v295_v10 = vadd.f32 %v294_v6, %v280_v5 }
 0x101   :  { %v296_v12 = vadd.f32 %v295_v10, %v281_v8  ;;  %v259_v13 = vadd.f32 %v397_v38, %v258_v9 }
 0x103   :  { %v260_v15 = vadd.f32 %v259_v13, %v214_v49  ;;  %v297_v16 = vadd.f32 %v296_v12, %v282_v11 }
 0x105   :  { %v298_v18 = vadd.f32 %v297_v16, %v283_v14  ;;  %v261_v19 = vadd.f32 %v400_v47, %v260_v15 }
 0x107   :  { %v262_v21 = vadd.f32 %v261_v19, %v224_v59  ;;  %v299_v22 = vadd.f32 %v298_v18, %v284_v17 }
 0x109   :  { %v263_v24 = vadd.f32 %v403_v57, %v262_v21  ;;  %v300_v25 = vadd.f32 %v299_v22, %v285_v20 }
 0x10b   :  { %v264_v26 = vrot.slane %v263_v24, 4  ;;  %v301_v27 = vadd.f32 %v300_v25, %v286_v23 }
 0x10d   :  { %v265_v28 = vadd.f32 %v264_v26, %v263_v24  ;;  %v302_v29 = vrot.slane %v301_v27, 4 }
 0x10f   :  { %v266_v30 = vrot.slane %v265_v28, 2  ;;  %v303_v31 = vadd.f32 %v302_v29, %v301_v27 }
 0x111   :  { %v267_v32 = vadd.f32 %v266_v30, %v265_v28  ;;  %v304_v33 = vrot.slane %v303_v31, 2 }
 0x113   :  { %v268_v34 = vrot.slane %v267_v32, 1  ;;  %v305_v35 = vadd.f32 %v304_v33, %v303_v31 }
 0x115   :  { %v269_v36 = vadd.f32 %v268_v34, %v267_v32  ;;  %v306_v37 = vrot.slane %v305_v35, 1 }
 0x117   :  { %270 = vst [vmem:[%s603_s3] sm:$0x1] %v269_v36  ;;  %v307_v38 = vadd.f32 %v306_v37, %v305_v35 }
 0x119   :  { %308 = vst [vmem:[%s604_s4] sm:$0x1] %v307_v38 }

// kernel: _lambda_.16
= control target key start
LH: loop header
LB: loop body
LE: loop exit
PB: predicated region body
PF: predicated region fallthrough
CT: control target
= control target key end

     0   :  { %vm42_vm0 = vcmask 736256   ;;  %vm91_vm1 = vcmask 1041408   ;;  %vm460_vm2 = vmmov 1   ;;  %s640_s1 = inlined_call_operand.vmem [shape: f32[90,128], index: 1, kind: input, shape index: {}]   ;;  %s641_s0 = inlined_call_operand.vmem [shape: f32[128,90], index: 0, kind: input, shape index: {}]   ;;  %s642_s2 = inlined_call_operand.vmem [shape: f32[128,128], index: 2, kind: output, shape index: {0}]   ;;  %s643_s3 = inlined_call_operand.vmem [shape: f32[1,128], index: 3, kind: output, shape index: {1}]   ;;  %s644_s4 = inlined_call_operand.vmem [shape: f32[1,128], index: 4, kind: output, shape index: {2}]  }
   0x1   :  { %v30_v0 = vld [vmem:[%s640_s1] sm:$0xff]  ;;  %v31_v1 = vld [vmem:[%s640_s1 + $0x8] sm:$0xff]  ;;  %v32_v2 = vld [vmem:[%s640_s1 + $0x10] sm:$0xff] }
   0x2   :  { %v421_v3 = vpack.c.bf16 %v31_v1, %v30_v0  ;;  %v33_v4 = vld [vmem:[%s640_s1 + $0x18] sm:$0xff]  ;;  %v34_v6 = vld [vmem:[%s640_s1 + $0x20] sm:$0xff]  ;;  %v35_v7 = vld [vmem:[%s640_s1 + $0x28] sm:$0xff] }
   0x3   :  { %v425_v5 = vpack.c.bf16 %v33_v4, %v32_v2  ;;  %v14_v8 = vld [vmem:[%s641_s0] sm:$0xff]  ;;  %v429_v9 = vpack.c.bf16 %v35_v7, %v34_v6  ;;  %v36_v10 = vld [vmem:[%s640_s1 + $0x30] sm:$0xff]  ;;  %v37_v11 = vld [vmem:[%s640_s1 + $0x38] sm:$0xff] }
   0x4   :  { %422 = vmatprep.subr.bf16.mxu0 %v421_v3  ;;  %447 = vmatprep.subr.bf16.mxu1 %v421_v3  ;;  %v22_v12 = vld [vmem:[%s641_s0 + $0x40] sm:$0xff]  ;;  %v433_v13 = vpack.c.bf16 %v37_v11, %v36_v10  ;;  %v39_v15 = vld [vmem:[%s640_s1 + $0x48] sm:$0xff]  ;;  %v40_v17 = vld [vmem:[%s640_s1 + $0x50] sm:$0xff] }
   0x5   :  { %424 = vmatpush3.bf16.msra.mxu0 %v421_v3  ;;  %453 = vmatpush3.bf16.msra.mxu1 %v421_v3  ;;  %v38_v14 = vld [vmem:[%s640_s1 + $0x40] sm:$0xff]  ;;  %v41_v18 = vld [vmem:[%s640_s1 + $0x58] sm:$0x3]  ;;  %vm442_vm3 = vmpackc.low %vm91_vm1, %vm460_vm2 }
   0x6   :  { %426 = vmatprep.subr.bf16.mxu0 %v425_v5  ;;  %448 = vmatprep.subr.bf16.mxu1 %v425_v5  ;;  %v437_v16 = vpack.c.bf16 %v39_v15, %v38_v14  ;;  %v441_v19 = vpack.c.bf16 %v41_v18, %v40_v17  ;;  %v15_v20 = vld [vmem:[%s641_s0 + $0x8] sm:$0xff]  ;;  %v16_v22 = vld [vmem:[%s641_s0 + $0x10] sm:$0xff]  ;;  %v17_v24 = vld [vmem:[%s641_s0 + $0x18] sm:$0xff] }
   0x7   :  { %397 = vmatprep.mubr.msk.f32.mxu0 %vm42_vm0, %v14_v8  ;;  %409 = vmatprep.mubr.msk.f32.mxu1 %vm42_vm0, %v22_v12  ;;  %v23_v21 = vld [vmem:[%s641_s0 + $0x48] sm:$0xff]  ;;  %v24_v23 = vld [vmem:[%s641_s0 + $0x50] sm:$0xff]  ;;  %v25_v25 = vld [vmem:[%s641_s0 + $0x58] sm:$0xff] }
   0x8   :  { %v18_v26 = vld [vmem:[%s641_s0 + $0x20] sm:$0xff]  ;;  %v19_v28 = vld [vmem:[%s641_s0 + $0x28] sm:$0xff]  ;;  %v20_v30 = vld [vmem:[%s641_s0 + $0x30] sm:$0xff] }
   0x9   :  { %428 = vmatpush3.bf16.msra.mxu0 %v425_v5  ;;  %454 = vmatpush3.bf16.msra.mxu1 %v425_v5  ;;  %v26_v27 = vld [vmem:[%s641_s0 + $0x60] sm:$0xff]  ;;  %v27_v29 = vld [vmem:[%s641_s0 + $0x68] sm:$0xff]  ;;  %v28_v31 = vld [vmem:[%s641_s0 + $0x70] sm:$0xff] }
   0xa   :  { %430 = vmatprep.subr.bf16.mxu0 %v429_v9  ;;  %449 = vmatprep.subr.bf16.mxu1 %v429_v9  ;;  %v21_v32 = vld [vmem:[%s641_s0 + $0x38] sm:$0xff] }
   0xb   :  { %v29_v33 = vld [vmem:[%s641_s0 + $0x78] sm:$0xff] }
   0xd   :  { %432 = vmatpush3.bf16.msra.mxu0 %v429_v9  ;;  %455 = vmatpush3.bf16.msra.mxu1 %v429_v9 }
   0xe   :  { %434 = vmatprep.subr.bf16.mxu0 %v433_v13  ;;  %450 = vmatprep.subr.bf16.mxu1 %v433_v13 }
  0x11   :  { %436 = vmatpush3.bf16.msra.mxu0 %v433_v13  ;;  %456 = vmatpush3.bf16.msra.mxu1 %v433_v13 }
  0x12   :  { %438 = vmatprep.subr.bf16.mxu0 %v437_v16  ;;  %451 = vmatprep.subr.bf16.mxu1 %v437_v16 }
  0x15   :  { %440 = vmatpush3.bf16.msra.mxu0 %v437_v16  ;;  %457 = vmatpush3.bf16.msra.mxu1 %v437_v16 }
  0x16   :  { %443 = vmatprep.subr.msk.bf16.mxu0 %vm442_vm3, %v441_v19  ;;  %452 = vmatprep.subr.msk.bf16.mxu1 %vm442_vm3, %v441_v19 }
  0x19   :  { %446 = vmatpush3.bf16.msk.msra.mxu0 %vm442_vm3, %v441_v19  ;;  %458 = vmatpush3.bf16.msk.msra.mxu1 %vm442_vm3, %v441_v19 }
  0x1c   :  { %398 = vmatmul.mubr.msk.f32.vlgmr.msra.gmra.mrb[0].mxu0 %vm42_vm0, %v15_v20  ;;  %410 = vmatmul.mubr.msk.f32.vlgmr.msra.gmra.mrb[0].mxu1 %vm42_vm0, %v23_v21 }
  0x1d   :  { %400 = vmatprep.mubr.msk.f32.mxu0 %vm42_vm0, %v16_v22  ;;  %412 = vmatprep.mubr.msk.f32.mxu1 %vm42_vm0, %v24_v23 }
  0x20   :  { %401 = vmatmul.mubr.msk.f32.gmra.mrb[2].mxu0 %vm42_vm0, %v17_v24  ;;  %413 = vmatmul.mubr.msk.f32.gmra.mrb[2].mxu1 %vm42_vm0, %v25_v25 }
  0x21   :  { %403 = vmatprep.mubr.msk.f32.mxu0 %vm42_vm0, %v18_v26  ;;  %415 = vmatprep.mubr.msk.f32.mxu1 %vm42_vm0, %v26_v27 }
  0x24   :  { %404 = vmatmul.mubr.msk.f32.gmra.mrb[4].mxu0 %vm42_vm0, %v19_v28  ;;  %416 = vmatmul.mubr.msk.f32.gmra.mrb[4].mxu1 %vm42_vm0, %v27_v29 }
  0x25   :  { %406 = vmatprep.mubr.msk.f32.mxu0 %vm42_vm0, %v20_v30  ;;  %418 = vmatprep.mubr.msk.f32.mxu1 %vm42_vm0, %v28_v31 }
  0x28   :  { %407 = vmatmul.mubr.msk.f32.gmra.mrb[6].mxu0 %vm42_vm0, %v21_v32  ;;  %419 = vmatmul.mubr.msk.f32.gmra.mrb[6].mxu1 %vm42_vm0, %v29_v33 }
  0xef   :  { %v399_v34 = vpop.f32.mrb[0].mxu0  ;;  %v411_v35 = vpop.f32.mrb[0].mxu1 }
  0xf0   :  { %241 = vst [vmem:[%s642_s2 + $0x8] sm:$0xff] %v399_v34  ;;  %v279_v36 = vmul.f32 %v399_v34, %v399_v34  ;;  %v161_v37 = vpop.f32.mrb[1].mxu0  ;;  %249 = vst [vmem:[%s642_s2 + $0x48] sm:$0xff] %v411_v35  ;;  %v201_v38 = vpop.f32.mrb[1].mxu1  ;;  %v287_v10 = vmul.f32 %v411_v35, %v411_v35 }
  0xf1   :  { %240 = vst [vmem:[%s642_s2] sm:$0xff] %v161_v37  ;;  %v256_v39 = vadd.f32 %v399_v34, %v161_v37  ;;  %v278_v40 = vmul.f32 %v161_v37, %v161_v37  ;;  %248 = vst [vmem:[%s642_s2 + $0x40] sm:$0xff] %v201_v38  ;;  %v286_v7 = vmul.f32 %v201_v38, %v201_v38 }
  0xf3   :  { %v294_v41 = vadd.f32 %v279_v36, %v278_v40  ;;  %v402_v42 = vpop.f32.mrb[2].mxu0  ;;  %v414_v43 = vpop.f32.mrb[2].mxu1 }
  0xf4   :  { %243 = vst [vmem:[%s642_s2 + $0x18] sm:$0xff] %v402_v42  ;;  %v171_v44 = vpop.f32.mrb[3].mxu0  ;;  %251 = vst [vmem:[%s642_s2 + $0x58] sm:$0xff] %v414_v43  ;;  %v211_v45 = vpop.f32.mrb[3].mxu1  ;;  %v281_v48 = vmul.f32 %v402_v42, %v402_v42  ;;  %v289_v16 = vmul.f32 %v414_v43, %v414_v43 }
  0xf5   :  { %242 = vst [vmem:[%s642_s2 + $0x10] sm:$0xff] %v171_v44  ;;  %v257_v46 = vadd.f32 %v256_v39, %v171_v44  ;;  %v280_v47 = vmul.f32 %v171_v44, %v171_v44  ;;  %250 = vst [vmem:[%s642_s2 + $0x50] sm:$0xff] %v211_v45  ;;  %v288_v13 = vmul.f32 %v211_v45, %v211_v45 }
  0xf7   :  { %v295_v49 = vadd.f32 %v294_v41, %v280_v47  ;;  %v405_v50 = vpop.f32.mrb[4].mxu0  ;;  %v258_v51 = vadd.f32 %v402_v42, %v257_v46  ;;  %v417_v52 = vpop.f32.mrb[4].mxu1 }
  0xf8   :  { %245 = vst [vmem:[%s642_s2 + $0x28] sm:$0xff] %v405_v50  ;;  %v181_v53 = vpop.f32.mrb[5].mxu0  ;;  %253 = vst [vmem:[%s642_s2 + $0x68] sm:$0xff] %v417_v52  ;;  %v221_v54 = vpop.f32.mrb[5].mxu1  ;;  %v283_v58 = vmul.f32 %v405_v50, %v405_v50  ;;  %v291_v22 = vmul.f32 %v417_v52, %v417_v52 }
  0xf9   :  { %244 = vst [vmem:[%s642_s2 + $0x20] sm:$0xff] %v181_v53  ;;  %v259_v55 = vadd.f32 %v258_v51, %v181_v53  ;;  %v282_v56 = vmul.f32 %v181_v53, %v181_v53  ;;  %v296_v57 = vadd.f32 %v295_v49, %v281_v48  ;;  %252 = vst [vmem:[%s642_s2 + $0x60] sm:$0xff] %v221_v54 }
  0xfa   :  { %v290_v19 = vmul.f32 %v221_v54, %v221_v54 }
  0xfb   :  { %v297_v59 = vadd.f32 %v296_v57, %v282_v56  ;;  %v408_v60 = vpop.f32.mrb[6].mxu0  ;;  %v260_v61 = vadd.f32 %v405_v50, %v259_v55  ;;  %v420_v62 = vpop.f32.mrb[6].mxu1 }
  0xfc   :  { %247 = vst [vmem:[%s642_s2 + $0x38] sm:$0xff] %v408_v60  ;;  %v191_v63 = vpop.f32.mrb[7].mxu0  ;;  %255 = vst [vmem:[%s642_s2 + $0x78] sm:$0xff] %v420_v62  ;;  %v231_v0 = vpop.f32.mrb[7].mxu1  ;;  %v285_v4 = vmul.f32 %v408_v60, %v408_v60  ;;  %v293_v28 = vmul.f32 %v420_v62, %v420_v62 }
  0xfd   :  { %246 = vst [vmem:[%s642_s2 + $0x30] sm:$0xff] %v191_v63  ;;  %v261_v1 = vadd.f32 %v260_v61, %v191_v63  ;;  %v284_v2 = vmul.f32 %v191_v63, %v191_v63  ;;  %v298_v3 = vadd.f32 %v297_v59, %v283_v58  ;;  %254 = vst [vmem:[%s642_s2 + $0x70] sm:$0xff] %v231_v0 }
  0xfe   :  { %v292_v25 = vmul.f32 %v231_v0, %v231_v0 }
  0xff   :  { %v262_v5 = vadd.f32 %v408_v60, %v261_v1  ;;  %v299_v6 = vadd.f32 %v298_v3, %v284_v2 }
 0x101   :  { %v300_v8 = vadd.f32 %v299_v6, %v285_v4  ;;  %v263_v9 = vadd.f32 %v262_v5, %v201_v38 }
 0x103   :  { %v301_v11 = vadd.f32 %v300_v8, %v286_v7  ;;  %v264_v12 = vadd.f32 %v411_v35, %v263_v9 }
 0x105   :  { %v265_v14 = vadd.f32 %v264_v12, %v211_v45  ;;  %v302_v15 = vadd.f32 %v301_v11, %v287_v10 }
 0x107   :  { %v303_v17 = vadd.f32 %v302_v15, %v288_v13  ;;  %v266_v18 = vadd.f32 %v414_v43, %v265_v14 }
 0x109   :  { %v267_v20 = vadd.f32 %v266_v18, %v221_v54  ;;  %v304_v21 = vadd.f32 %v303_v17, %v289_v16 }
 0x10b   :  { %v305_v23 = vadd.f32 %v304_v21, %v290_v19  ;;  %v268_v24 = vadd.f32 %v417_v52, %v267_v20 }
 0x10d   :  { %v269_v26 = vadd.f32 %v268_v24, %v231_v0  ;;  %v306_v27 = vadd.f32 %v305_v23, %v291_v22 }
 0x10f   :  { %v270_v29 = vadd.f32 %v420_v62, %v269_v26  ;;  %v307_v30 = vadd.f32 %v306_v27, %v292_v25 }
 0x111   :  { %v271_v31 = vrot.slane %v270_v29, 4  ;;  %v308_v32 = vadd.f32 %v307_v30, %v293_v28 }
 0x113   :  { %v272_v33 = vadd.f32 %v271_v31, %v270_v29  ;;  %v309_v34 = vrot.slane %v308_v32, 4 }
 0x115   :  { %v273_v35 = vrot.slane %v272_v33, 2  ;;  %v310_v36 = vadd.f32 %v309_v34, %v308_v32 }
 0x117   :  { %v274_v37 = vadd.f32 %v273_v35, %v272_v33  ;;  %v311_v38 = vrot.slane %v310_v36, 2 }
 0x119   :  { %v275_v39 = vrot.slane %v274_v37, 1  ;;  %v312_v40 = vadd.f32 %v311_v38, %v310_v36 }
 0x11b   :  { %v276_v41 = vadd.f32 %v275_v39, %v274_v37  ;;  %v313_v42 = vrot.slane %v312_v40, 1 }
 0x11d   :  { %277 = vst [vmem:[%s643_s3] sm:$0x1] %v276_v41  ;;  %v314_v43 = vadd.f32 %v313_v42, %v312_v40 }
 0x11f   :  { %315 = vst [vmem:[%s644_s4] sm:$0x1] %v314_v43 }

</bundles_post_ra>
